<compile_context>
chip_gen: v5e
topology: v5e:2x2
jax: 0.10.0
libtpu: 0.0.40
codegen_flags: <defaults>
</compile_context>

<pallas_src>
import jax
import jax.numpy as jnp
from jax.experimental import pallas as pl
from jax.experimental.pallas import tpu as pltpu

_BN_EPS = 1e-5
_DROP_P = 0.5
_KEEP_P = 1.0 - _DROP_P
_INV_KEEP = 1.0 / _KEEP_P


def _sigmoid(h):
    # tanh-identity sigmoid: single EUP transcendental per element.
    return 0.5 * jnp.tanh(0.5 * h) + 0.5


def _batchnorm_train(h, gamma, beta):
    # Fused BatchNorm1d, training mode (biased batch variance):
    #   var = E[h^2] - E[h]^2 ; y = h * scale + shift
    inv_b = 1.0 / h.shape[0]
    mean = jnp.sum(h, axis=0, keepdims=True) * inv_b
    meansq = jnp.sum(h * h, axis=0, keepdims=True) * inv_b
    var = meansq - mean * mean
    scale = gamma * jax.lax.rsqrt(var + _BN_EPS)
    shift = beta - mean * scale
    return h * scale + shift


def _dropout(h, u):
    # Inverted dropout with precomputed uniforms: one compare + one select.
    return jnp.where(u < _KEEP_P, h * _INV_KEEP, 0.0)


def _gnet_kernel(x_ref, drop_ref,
                 w1_ref, b1_ref, g1_ref, be1_ref,
                 w2_ref, b2_ref, g2_ref, be2_ref,
                 w3_ref, b3_ref, g3_ref, be3_ref,
                 w4_ref, b4_ref,
                 o_ref):
    x = x_ref[...]
    nan_mask = jnp.logical_not(jnp.isnan(x))            # mask = 1 - isnan(x)
    mask_f = nan_mask.astype(jnp.float32)
    xz = jnp.where(nan_mask, x, 0.0)                    # where(mask, x, 0)

    # Layer 1: Linear(2F -> F) on concat([x, mask]) as a single K=2F matmul.
    xm = jnp.concatenate([xz, mask_f], axis=1)
    h = jnp.dot(xm, w1_ref[...], preferred_element_type=jnp.float32) + b1_ref[...]
    h = _sigmoid(h)
    h = _batchnorm_train(h, g1_ref[...], be1_ref[...])
    h = _dropout(h, drop_ref[0])

    # Layer 2: Linear(F -> F)
    h = jnp.dot(h, w2_ref[...], preferred_element_type=jnp.float32) + b2_ref[...]
    h = _sigmoid(h)
    h = _batchnorm_train(h, g2_ref[...], be2_ref[...])
    h = _dropout(h, drop_ref[1])

    # Layer 3: Linear(F -> F)
    h = jnp.dot(h, w3_ref[...], preferred_element_type=jnp.float32) + b3_ref[...]
    h = _sigmoid(h)
    h = _batchnorm_train(h, g3_ref[...], be3_ref[...])
    h = _dropout(h, drop_ref[2])

    # Layer 4: Linear(F -> F) + Tanh
    h = jnp.dot(h, w4_ref[...], preferred_element_type=jnp.float32) + b4_ref[...]
    o_ref[...] = jnp.tanh(h)


def init_params(key, n_features):
    """Deterministic synthetic parameters (PyTorch-default-style uniform init).

    Linear weights are stored (in, out) so the kernel computes y = x @ W + b,
    equal to PyTorch's x @ weight.T + bias.
    """
    f = n_features
    ks = jax.random.split(key, 4)

    def lin(k, fan_in, fan_out):
        kw, kb = jax.random.split(k)
        bound = 1.0 / float(fan_in) ** 0.5
        w = jax.random.uniform(kw, (fan_in, fan_out), jnp.float32, -bound, bound)
        b = jax.random.uniform(kb, (1, fan_out), jnp.float32, -bound, bound)
        return w, b

    w1, b1 = lin(ks[0], 2 * f, f)
    w2, b2 = lin(ks[1], f, f)
    w3, b3 = lin(ks[2], f, f)
    w4, b4 = lin(ks[3], f, f)
    ones = jnp.ones((1, f), jnp.float32)
    zeros = jnp.zeros((1, f), jnp.float32)
    return dict(
        w1=w1, b1=b1, g1=ones, be1=zeros,
        w2=w2, b2=b2, g2=ones, be2=zeros,
        w3=w3, b3=b3, g3=ones, be3=zeros,
        w4=w4, b4=b4,
    )


def gnet_fcdrop_forward(x_m_in, params, seed):
    n_features = params["w2"].shape[0]
    orig_shape = x_m_in.shape
    x2d = x_m_in.reshape(-1, n_features).astype(jnp.float32)
    batch, feat = x2d.shape

    # Dropout uniforms for the three GDropout layers, generated outside the
    # kernel (works on both real TPUs and interpret mode; deterministic).
    drop_u = jax.random.uniform(jax.random.PRNGKey(seed), (3, batch, feat),
                                dtype=jnp.float32)

    tensors = [
        x2d, drop_u,
        params["w1"], params["b1"], params["g1"], params["be1"],
        params["w2"], params["b2"], params["g2"], params["be2"],
        params["w3"], params["b3"], params["g3"], params["be3"],
        params["w4"], params["b4"],
    ]

    def full_spec(shape):
        return pl.BlockSpec(shape, lambda i: (0,) * len(shape))

    out = pl.pallas_call(
        _gnet_kernel,
        out_shape=jax.ShapeDtypeStruct((batch, feat), jnp.float32),
        grid_spec=pltpu.PrefetchScalarGridSpec(
            num_scalar_prefetch=0,
            grid=(1,),
            in_specs=[full_spec(t.shape) for t in tensors],
            out_specs=full_spec((batch, feat)),
        ),
        compiler_params=pltpu.CompilerParams(
            dimension_semantics=("arbitrary",),
            vmem_limit_bytes=48 * 1024 * 1024,
        ),
    )(*tensors)

    return out.reshape(orig_shape)


if __name__ == "__main__":
    n_features = 32
    key = jax.random.PRNGKey(0)
    kx, kn, kp = jax.random.split(key, 3)

    # Input consistent with the module: any shape whose flattened view is
    # (-1, n_features).
    x = jax.random.normal(kx, (2, 4, 16, n_features), jnp.float32)
    # Inject some NaNs deterministically so the mask / zero-fill path runs.
    nan_sel = jax.random.uniform(kn, x.shape) < 0.1
    x = jnp.where(nan_sel, jnp.nan, x)

    params = init_params(kp, n_features)

    out = gnet_fcdrop_forward(x, params, seed=42)
    out = jax.block_until_ready(out)

    assert out.shape == x.shape
    assert out.dtype == jnp.float32
    assert bool(jnp.all(jnp.isfinite(out)))  # NaN inputs are masked before the net
    assert bool(jnp.all(jnp.abs(out) <= 1.0))  # final Tanh bound
    print("KERNEL_OK")
</pallas_src>

<mosaic_0001>
module attributes {stable_mosaic.version = 11 : i64} {
  func.func @_gnet_kernel(%arg0: i32, %arg1: memref<128x32xf32, #tpu.memory_space<vmem>>, %arg2: memref<3x128x32xf32, #tpu.memory_space<vmem>>, %arg3: memref<64x32xf32, #tpu.memory_space<vmem>>, %arg4: memref<1x32xf32, #tpu.memory_space<vmem>>, %arg5: memref<1x32xf32, #tpu.memory_space<vmem>>, %arg6: memref<1x32xf32, #tpu.memory_space<vmem>>, %arg7: memref<32x32xf32, #tpu.memory_space<vmem>>, %arg8: memref<1x32xf32, #tpu.memory_space<vmem>>, %arg9: memref<1x32xf32, #tpu.memory_space<vmem>>, %arg10: memref<1x32xf32, #tpu.memory_space<vmem>>, %arg11: memref<32x32xf32, #tpu.memory_space<vmem>>, %arg12: memref<1x32xf32, #tpu.memory_space<vmem>>, %arg13: memref<1x32xf32, #tpu.memory_space<vmem>>, %arg14: memref<1x32xf32, #tpu.memory_space<vmem>>, %arg15: memref<32x32xf32, #tpu.memory_space<vmem>>, %arg16: memref<1x32xf32, #tpu.memory_space<vmem>>, %arg17: memref<128x32xf32, #tpu.memory_space<vmem>>) attributes {dimension_semantics = [#tpu.dimension_semantics<arbitrary>], iteration_bounds = array<i64: 1>, scalar_prefetch = 0 : i64, scratch_operands = 0 : i64, tpu.core_type = #tpu.core_type<tc>, window_params = [{pipeline_mode = #tpu.pipeline_mode<synchronous>, transform_indices = @transform_0, window_bounds = array<i64: 128, 32>}, {pipeline_mode = #tpu.pipeline_mode<synchronous>, transform_indices = @transform_1, window_bounds = array<i64: 3, 128, 32>}, {pipeline_mode = #tpu.pipeline_mode<synchronous>, transform_indices = @transform_2, window_bounds = array<i64: 64, 32>}, {pipeline_mode = #tpu.pipeline_mode<synchronous>, transform_indices = @transform_3, window_bounds = array<i64: 1, 32>}, {pipeline_mode = #tpu.pipeline_mode<synchronous>, transform_indices = @transform_4, window_bounds = array<i64: 1, 32>}, {pipeline_mode = #tpu.pipeline_mode<synchronous>, transform_indices = @transform_5, window_bounds = array<i64: 1, 32>}, {pipeline_mode = #tpu.pipeline_mode<synchronous>, transform_indices = @transform_6, window_bounds = array<i64: 32, 32>}, {pipeline_mode = #tpu.pipeline_mode<synchronous>, transform_indices = @transform_7, window_bounds = array<i64: 1, 32>}, {pipeline_mode = #tpu.pipeline_mode<synchronous>, transform_indices = @transform_8, window_bounds = array<i64: 1, 32>}, {pipeline_mode = #tpu.pipeline_mode<synchronous>, transform_indices = @transform_9, window_bounds = array<i64: 1, 32>}, {pipeline_mode = #tpu.pipeline_mode<synchronous>, transform_indices = @transform_10, window_bounds = array<i64: 32, 32>}, {pipeline_mode = #tpu.pipeline_mode<synchronous>, transform_indices = @transform_11, window_bounds = array<i64: 1, 32>}, {pipeline_mode = #tpu.pipeline_mode<synchronous>, transform_indices = @transform_12, window_bounds = array<i64: 1, 32>}, {pipeline_mode = #tpu.pipeline_mode<synchronous>, transform_indices = @transform_13, window_bounds = array<i64: 1, 32>}, {pipeline_mode = #tpu.pipeline_mode<synchronous>, transform_indices = @transform_14, window_bounds = array<i64: 32, 32>}, {pipeline_mode = #tpu.pipeline_mode<synchronous>, transform_indices = @transform_15, window_bounds = array<i64: 1, 32>}, {pipeline_mode = #tpu.pipeline_mode<synchronous>, transform_indices = @transform_16, window_bounds = array<i64: 128, 32>}]} {
    %c0 = arith.constant 0 : index
    %c0_0 = arith.constant 0 : index
    %0 = vector.load %arg1[%c0, %c0_0] : memref<128x32xf32, #tpu.memory_space<vmem>>, vector<128x32xf32>
    %1 = arith.cmpf one, %0, %0 : vector<128x32xf32>
    %cst = arith.constant dense<true> : vector<128x32xi1>
    %2 = arith.xori %1, %cst : vector<128x32xi1>
    %3 = arith.extui %2 : vector<128x32xi1> to vector<128x32xi32>
    %4 = arith.sitofp %3 : vector<128x32xi32> to vector<128x32xf32>
    %cst_1 = arith.constant 0.000000e+00 : f32
    %5 = vector.broadcast %cst_1 : f32 to vector<128x32xf32>
    %6 = arith.select %2, %0, %5 : vector<128x32xi1>, vector<128x32xf32>
    %7 = tpu.concatenate %6, %4 in 1 : vector<128x32xf32>, vector<128x32xf32> -> vector<128x64xf32>
    %c0_2 = arith.constant 0 : index
    %c0_3 = arith.constant 0 : index
    %8 = vector.load %arg3[%c0_2, %c0_3] : memref<64x32xf32, #tpu.memory_space<vmem>>, vector<64x32xf32>
    %cst_4 = arith.constant dense<0.000000e+00> : vector<128x32xf32>
    %9 = tpu.matmul %7, %8, %cst_4 {dimension_numbers = #tpu.dot_dimension_numbers<[1], [0], [0], [1], [0, 0, 1, 1], [], []>} : vector<128x64xf32>, vector<64x32xf32>, vector<128x32xf32> -> vector<128x32xf32>
    %c0_5 = arith.constant 0 : index
    %c0_6 = arith.constant 0 : index
    %10 = vector.load %arg4[%c0_5, %c0_6] : memref<1x32xf32, #tpu.memory_space<vmem>>, vector<1x32xf32>
    %11 = vector.broadcast %10 : vector<1x32xf32> to vector<128x32xf32>
    %12 = arith.addf %9, %11 : vector<128x32xf32>
    %cst_7 = arith.constant 5.000000e-01 : f32
    %13 = vector.broadcast %cst_7 : f32 to vector<128x32xf32>
    %14 = arith.mulf %13, %12 : vector<128x32xf32>
    %15 = math.tanh %14 : vector<128x32xf32>
    %cst_8 = arith.constant 5.000000e-01 : f32
    %16 = vector.broadcast %cst_8 : f32 to vector<128x32xf32>
    %17 = arith.mulf %16, %15 : vector<128x32xf32>
    %cst_9 = arith.constant 5.000000e-01 : f32
    %18 = vector.broadcast %cst_9 : f32 to vector<128x32xf32>
    %19 = arith.addf %17, %18 : vector<128x32xf32>
    %c0_10 = arith.constant 0 : index
    %c0_11 = arith.constant 0 : index
    %20 = vector.load %arg5[%c0_10, %c0_11] : memref<1x32xf32, #tpu.memory_space<vmem>>, vector<1x32xf32>
    %c0_12 = arith.constant 0 : index
    %c0_13 = arith.constant 0 : index
    %21 = vector.load %arg6[%c0_12, %c0_13] : memref<1x32xf32, #tpu.memory_space<vmem>>, vector<1x32xf32>
    %cst_14 = arith.constant dense<0.000000e+00> : vector<32xf32>
    %22 = vector.multi_reduction <add>, %19, %cst_14 [0] : vector<128x32xf32> to vector<32xf32>
    %23 = vector.shape_cast %22 : vector<32xf32> to vector<1x32xf32>
    %cst_15 = arith.constant 7.812500e-03 : f32
    %24 = vector.broadcast %cst_15 : f32 to vector<1x32xf32>
    %25 = arith.mulf %23, %24 : vector<1x32xf32>
    %26 = arith.mulf %19, %19 : vector<128x32xf32>
    %cst_16 = arith.constant dense<0.000000e+00> : vector<32xf32>
    %27 = vector.multi_reduction <add>, %26, %cst_16 [0] : vector<128x32xf32> to vector<32xf32>
    %28 = vector.shape_cast %27 : vector<32xf32> to vector<1x32xf32>
    %cst_17 = arith.constant 7.812500e-03 : f32
    %29 = vector.broadcast %cst_17 : f32 to vector<1x32xf32>
    %30 = arith.mulf %28, %29 : vector<1x32xf32>
    %31 = arith.mulf %25, %25 : vector<1x32xf32>
    %32 = arith.subf %30, %31 : vector<1x32xf32>
    %cst_18 = arith.constant 9.99999974E-6 : f32
    %33 = vector.broadcast %cst_18 : f32 to vector<1x32xf32>
    %34 = arith.addf %32, %33 : vector<1x32xf32>
    %35 = math.rsqrt %34 : vector<1x32xf32>
    %36 = arith.mulf %20, %35 : vector<1x32xf32>
    %37 = arith.mulf %25, %36 : vector<1x32xf32>
    %38 = arith.subf %21, %37 : vector<1x32xf32>
    %39 = vector.broadcast %36 : vector<1x32xf32> to vector<128x32xf32>
    %40 = arith.mulf %19, %39 : vector<128x32xf32>
    %41 = vector.broadcast %38 : vector<1x32xf32> to vector<128x32xf32>
    %42 = arith.addf %40, %41 : vector<128x32xf32>
    %c0_19 = arith.constant 0 : index
    %c0_20 = arith.constant 0 : index
    %c0_21 = arith.constant 0 : index
    %43 = vector.load %arg2[%c0_19, %c0_20, %c0_21] : memref<3x128x32xf32, #tpu.memory_space<vmem>>, vector<1x128x32xf32>
    %44 = vector.shape_cast %43 : vector<1x128x32xf32> to vector<128x32xf32>
    %cst_22 = arith.constant 5.000000e-01 : f32
    %45 = vector.broadcast %cst_22 : f32 to vector<128x32xf32>
    %46 = arith.cmpf olt, %44, %45 : vector<128x32xf32>
    %cst_23 = arith.constant 2.000000e+00 : f32
    %47 = vector.broadcast %cst_23 : f32 to vector<128x32xf32>
    %48 = arith.mulf %42, %47 : vector<128x32xf32>
    %cst_24 = arith.constant 0.000000e+00 : f32
    %49 = vector.broadcast %cst_24 : f32 to vector<128x32xf32>
    %50 = arith.select %46, %48, %49 : vector<128x32xi1>, vector<128x32xf32>
    %c0_25 = arith.constant 0 : index
    %c0_26 = arith.constant 0 : index
    %51 = vector.load %arg7[%c0_25, %c0_26] : memref<32x32xf32, #tpu.memory_space<vmem>>, vector<32x32xf32>
    %cst_27 = arith.constant dense<0.000000e+00> : vector<128x32xf32>
    %52 = tpu.matmul %50, %51, %cst_27 {dimension_numbers = #tpu.dot_dimension_numbers<[1], [0], [0], [1], [0, 0, 1, 1], [], []>} : vector<128x32xf32>, vector<32x32xf32>, vector<128x32xf32> -> vector<128x32xf32>
    %c0_28 = arith.constant 0 : index
    %c0_29 = arith.constant 0 : index
    %53 = vector.load %arg8[%c0_28, %c0_29] : memref<1x32xf32, #tpu.memory_space<vmem>>, vector<1x32xf32>
    %54 = vector.broadcast %53 : vector<1x32xf32> to vector<128x32xf32>
    %55 = arith.addf %52, %54 : vector<128x32xf32>
    %cst_30 = arith.constant 5.000000e-01 : f32
    %56 = vector.broadcast %cst_30 : f32 to vector<128x32xf32>
    %57 = arith.mulf %56, %55 : vector<128x32xf32>
    %58 = math.tanh %57 : vector<128x32xf32>
    %cst_31 = arith.constant 5.000000e-01 : f32
    %59 = vector.broadcast %cst_31 : f32 to vector<128x32xf32>
    %60 = arith.mulf %59, %58 : vector<128x32xf32>
    %cst_32 = arith.constant 5.000000e-01 : f32
    %61 = vector.broadcast %cst_32 : f32 to vector<128x32xf32>
    %62 = arith.addf %60, %61 : vector<128x32xf32>
    %c0_33 = arith.constant 0 : index
    %c0_34 = arith.constant 0 : index
    %63 = vector.load %arg9[%c0_33, %c0_34] : memref<1x32xf32, #tpu.memory_space<vmem>>, vector<1x32xf32>
    %c0_35 = arith.constant 0 : index
    %c0_36 = arith.constant 0 : index
    %64 = vector.load %arg10[%c0_35, %c0_36] : memref<1x32xf32, #tpu.memory_space<vmem>>, vector<1x32xf32>
    %cst_37 = arith.constant dense<0.000000e+00> : vector<32xf32>
    %65 = vector.multi_reduction <add>, %62, %cst_37 [0] : vector<128x32xf32> to vector<32xf32>
    %66 = vector.shape_cast %65 : vector<32xf32> to vector<1x32xf32>
    %cst_38 = arith.constant 7.812500e-03 : f32
    %67 = vector.broadcast %cst_38 : f32 to vector<1x32xf32>
    %68 = arith.mulf %66, %67 : vector<1x32xf32>
    %69 = arith.mulf %62, %62 : vector<128x32xf32>
    %cst_39 = arith.constant dense<0.000000e+00> : vector<32xf32>
    %70 = vector.multi_reduction <add>, %69, %cst_39 [0] : vector<128x32xf32> to vector<32xf32>
    %71 = vector.shape_cast %70 : vector<32xf32> to vector<1x32xf32>
    %cst_40 = arith.constant 7.812500e-03 : f32
    %72 = vector.broadcast %cst_40 : f32 to vector<1x32xf32>
    %73 = arith.mulf %71, %72 : vector<1x32xf32>
    %74 = arith.mulf %68, %68 : vector<1x32xf32>
    %75 = arith.subf %73, %74 : vector<1x32xf32>
    %cst_41 = arith.constant 9.99999974E-6 : f32
    %76 = vector.broadcast %cst_41 : f32 to vector<1x32xf32>
    %77 = arith.addf %75, %76 : vector<1x32xf32>
    %78 = math.rsqrt %77 : vector<1x32xf32>
    %79 = arith.mulf %63, %78 : vector<1x32xf32>
    %80 = arith.mulf %68, %79 : vector<1x32xf32>
    %81 = arith.subf %64, %80 : vector<1x32xf32>
    %82 = vector.broadcast %79 : vector<1x32xf32> to vector<128x32xf32>
    %83 = arith.mulf %62, %82 : vector<128x32xf32>
    %84 = vector.broadcast %81 : vector<1x32xf32> to vector<128x32xf32>
    %85 = arith.addf %83, %84 : vector<128x32xf32>
    %c1 = arith.constant 1 : index
    %c0_42 = arith.constant 0 : index
    %c0_43 = arith.constant 0 : index
    %86 = vector.load %arg2[%c1, %c0_42, %c0_43] : memref<3x128x32xf32, #tpu.memory_space<vmem>>, vector<1x128x32xf32>
    %87 = vector.shape_cast %86 : vector<1x128x32xf32> to vector<128x32xf32>
    %cst_44 = arith.constant 5.000000e-01 : f32
    %88 = vector.broadcast %cst_44 : f32 to vector<128x32xf32>
    %89 = arith.cmpf olt, %87, %88 : vector<128x32xf32>
    %cst_45 = arith.constant 2.000000e+00 : f32
    %90 = vector.broadcast %cst_45 : f32 to vector<128x32xf32>
    %91 = arith.mulf %85, %90 : vector<128x32xf32>
    %cst_46 = arith.constant 0.000000e+00 : f32
    %92 = vector.broadcast %cst_46 : f32 to vector<128x32xf32>
    %93 = arith.select %89, %91, %92 : vector<128x32xi1>, vector<128x32xf32>
    %c0_47 = arith.constant 0 : index
    %c0_48 = arith.constant 0 : index
    %94 = vector.load %arg11[%c0_47, %c0_48] : memref<32x32xf32, #tpu.memory_space<vmem>>, vector<32x32xf32>
    %cst_49 = arith.constant dense<0.000000e+00> : vector<128x32xf32>
    %95 = tpu.matmul %93, %94, %cst_49 {dimension_numbers = #tpu.dot_dimension_numbers<[1], [0], [0], [1], [0, 0, 1, 1], [], []>} : vector<128x32xf32>, vector<32x32xf32>, vector<128x32xf32> -> vector<128x32xf32>
    %c0_50 = arith.constant 0 : index
    %c0_51 = arith.constant 0 : index
    %96 = vector.load %arg12[%c0_50, %c0_51] : memref<1x32xf32, #tpu.memory_space<vmem>>, vector<1x32xf32>
    %97 = vector.broadcast %96 : vector<1x32xf32> to vector<128x32xf32>
    %98 = arith.addf %95, %97 : vector<128x32xf32>
    %cst_52 = arith.constant 5.000000e-01 : f32
    %99 = vector.broadcast %cst_52 : f32 to vector<128x32xf32>
    %100 = arith.mulf %99, %98 : vector<128x32xf32>
    %101 = math.tanh %100 : vector<128x32xf32>
    %cst_53 = arith.constant 5.000000e-01 : f32
    %102 = vector.broadcast %cst_53 : f32 to vector<128x32xf32>
    %103 = arith.mulf %102, %101 : vector<128x32xf32>
    %cst_54 = arith.constant 5.000000e-01 : f32
    %104 = vector.broadcast %cst_54 : f32 to vector<128x32xf32>
    %105 = arith.addf %103, %104 : vector<128x32xf32>
    %c0_55 = arith.constant 0 : index
    %c0_56 = arith.constant 0 : index
    %106 = vector.load %arg13[%c0_55, %c0_56] : memref<1x32xf32, #tpu.memory_space<vmem>>, vector<1x32xf32>
    %c0_57 = arith.constant 0 : index
    %c0_58 = arith.constant 0 : index
    %107 = vector.load %arg14[%c0_57, %c0_58] : memref<1x32xf32, #tpu.memory_space<vmem>>, vector<1x32xf32>
    %cst_59 = arith.constant dense<0.000000e+00> : vector<32xf32>
    %108 = vector.multi_reduction <add>, %105, %cst_59 [0] : vector<128x32xf32> to vector<32xf32>
    %109 = vector.shape_cast %108 : vector<32xf32> to vector<1x32xf32>
    %cst_60 = arith.constant 7.812500e-03 : f32
    %110 = vector.broadcast %cst_60 : f32 to vector<1x32xf32>
    %111 = arith.mulf %109, %110 : vector<1x32xf32>
    %112 = arith.mulf %105, %105 : vector<128x32xf32>
    %cst_61 = arith.constant dense<0.000000e+00> : vector<32xf32>
    %113 = vector.multi_reduction <add>, %112, %cst_61 [0] : vector<128x32xf32> to vector<32xf32>
    %114 = vector.shape_cast %113 : vector<32xf32> to vector<1x32xf32>
    %cst_62 = arith.constant 7.812500e-03 : f32
    %115 = vector.broadcast %cst_62 : f32 to vector<1x32xf32>
    %116 = arith.mulf %114, %115 : vector<1x32xf32>
    %117 = arith.mulf %111, %111 : vector<1x32xf32>
    %118 = arith.subf %116, %117 : vector<1x32xf32>
    %cst_63 = arith.constant 9.99999974E-6 : f32
    %119 = vector.broadcast %cst_63 : f32 to vector<1x32xf32>
    %120 = arith.addf %118, %119 : vector<1x32xf32>
    %121 = math.rsqrt %120 : vector<1x32xf32>
    %122 = arith.mulf %106, %121 : vector<1x32xf32>
    %123 = arith.mulf %111, %122 : vector<1x32xf32>
    %124 = arith.subf %107, %123 : vector<1x32xf32>
    %125 = vector.broadcast %122 : vector<1x32xf32> to vector<128x32xf32>
    %126 = arith.mulf %105, %125 : vector<128x32xf32>
    %127 = vector.broadcast %124 : vector<1x32xf32> to vector<128x32xf32>
    %128 = arith.addf %126, %127 : vector<128x32xf32>
    %c2 = arith.constant 2 : index
    %c0_64 = arith.constant 0 : index
    %c0_65 = arith.constant 0 : index
    %129 = vector.load %arg2[%c2, %c0_64, %c0_65] : memref<3x128x32xf32, #tpu.memory_space<vmem>>, vector<1x128x32xf32>
    %130 = vector.shape_cast %129 : vector<1x128x32xf32> to vector<128x32xf32>
    %cst_66 = arith.constant 5.000000e-01 : f32
    %131 = vector.broadcast %cst_66 : f32 to vector<128x32xf32>
    %132 = arith.cmpf olt, %130, %131 : vector<128x32xf32>
    %cst_67 = arith.constant 2.000000e+00 : f32
    %133 = vector.broadcast %cst_67 : f32 to vector<128x32xf32>
    %134 = arith.mulf %128, %133 : vector<128x32xf32>
    %cst_68 = arith.constant 0.000000e+00 : f32
    %135 = vector.broadcast %cst_68 : f32 to vector<128x32xf32>
    %136 = arith.select %132, %134, %135 : vector<128x32xi1>, vector<128x32xf32>
    %c0_69 = arith.constant 0 : index
    %c0_70 = arith.constant 0 : index
    %137 = vector.load %arg15[%c0_69, %c0_70] : memref<32x32xf32, #tpu.memory_space<vmem>>, vector<32x32xf32>
    %cst_71 = arith.constant dense<0.000000e+00> : vector<128x32xf32>
    %138 = tpu.matmul %136, %137, %cst_71 {dimension_numbers = #tpu.dot_dimension_numbers<[1], [0], [0], [1], [0, 0, 1, 1], [], []>} : vector<128x32xf32>, vector<32x32xf32>, vector<128x32xf32> -> vector<128x32xf32>
    %c0_72 = arith.constant 0 : index
    %c0_73 = arith.constant 0 : index
    %139 = vector.load %arg16[%c0_72, %c0_73] : memref<1x32xf32, #tpu.memory_space<vmem>>, vector<1x32xf32>
    %140 = vector.broadcast %139 : vector<1x32xf32> to vector<128x32xf32>
    %141 = arith.addf %138, %140 : vector<128x32xf32>
    %142 = math.tanh %141 : vector<128x32xf32>
    %c0_74 = arith.constant 0 : index
    %c0_75 = arith.constant 0 : index
    %143 = vector.load %arg17[%c0_74, %c0_75] : memref<128x32xf32, #tpu.memory_space<vmem>>, vector<128x32xf32>
    tpu.vector_store %arg17[%c0_74, %c0_75], %142 {strides = array<i32>} : memref<128x32xf32, #tpu.memory_space<vmem>>, vector<128x32xf32>,
    return
  }
  func.func @transform_0(%arg0: i32) -> (i32, i32) {
    %c0_i32 = arith.constant 0 : i32
    %c0_i32_0 = arith.constant 0 : i32
    %c0_i32_1 = arith.constant 0 : i32
    return %c0_i32, %c0_i32_0 : i32, i32
  }
  func.func @transform_1(%arg0: i32) -> (i32, i32, i32) {
    %c0_i32 = arith.constant 0 : i32
    %c0_i32_0 = arith.constant 0 : i32
    %c0_i32_1 = arith.constant 0 : i32
    %c0_i32_2 = arith.constant 0 : i32
    return %c0_i32, %c0_i32_0, %c0_i32_1 : i32, i32, i32
  }
  func.func @transform_2(%arg0: i32) -> (i32, i32) {
    %c0_i32 = arith.constant 0 : i32
    %c0_i32_0 = arith.constant 0 : i32
    %c0_i32_1 = arith.constant 0 : i32
    return %c0_i32, %c0_i32_0 : i32, i32
  }
  func.func @transform_3(%arg0: i32) -> (i32, i32) {
    %c0_i32 = arith.constant 0 : i32
    %c0_i32_0 = arith.constant 0 : i32
    %c0_i32_1 = arith.constant 0 : i32
    return %c0_i32, %c0_i32_0 : i32, i32
  }
  func.func @transform_4(%arg0: i32) -> (i32, i32) {
    %c0_i32 = arith.constant 0 : i32
    %c0_i32_0 = arith.constant 0 : i32
    %c0_i32_1 = arith.constant 0 : i32
    return %c0_i32, %c0_i32_0 : i32, i32
  }
  func.func @transform_5(%arg0: i32) -> (i32, i32) {
    %c0_i32 = arith.constant 0 : i32
    %c0_i32_0 = arith.constant 0 : i32
    %c0_i32_1 = arith.constant 0 : i32
    return %c0_i32, %c0_i32_0 : i32, i32
  }
  func.func @transform_6(%arg0: i32) -> (i32, i32) {
    %c0_i32 = arith.constant 0 : i32
    %c0_i32_0 = arith.constant 0 : i32
    %c0_i32_1 = arith.constant 0 : i32
    return %c0_i32, %c0_i32_0 : i32, i32
  }
  func.func @transform_7(%arg0: i32) -> (i32, i32) {
    %c0_i32 = arith.constant 0 : i32
    %c0_i32_0 = arith.constant 0 : i32
    %c0_i32_1 = arith.constant 0 : i32
    return %c0_i32, %c0_i32_0 : i32, i32
  }
  func.func @transform_8(%arg0: i32) -> (i32, i32) {
    %c0_i32 = arith.constant 0 : i32
    %c0_i32_0 = arith.constant 0 : i32
    %c0_i32_1 = arith.constant 0 : i32
    return %c0_i32, %c0_i32_0 : i32, i32
  }
  func.func @transform_9(%arg0: i32) -> (i32, i32) {
    %c0_i32 = arith.constant 0 : i32
    %c0_i32_0 = arith.constant 0 : i32
    %c0_i32_1 = arith.constant 0 : i32
    return %c0_i32, %c0_i32_0 : i32, i32
  }
  func.func @transform_10(%arg0: i32) -> (i32, i32) {
    %c0_i32 = arith.constant 0 : i32
    %c0_i32_0 = arith.constant 0 : i32
    %c0_i32_1 = arith.constant 0 : i32
    return %c0_i32, %c0_i32_0 : i32, i32
  }
  func.func @transform_11(%arg0: i32) -> (i32, i32) {
    %c0_i32 = arith.constant 0 : i32
    %c0_i32_0 = arith.constant 0 : i32
    %c0_i32_1 = arith.constant 0 : i32
    return %c0_i32, %c0_i32_0 : i32, i32
  }
  func.func @transform_12(%arg0: i32) -> (i32, i32) {
    %c0_i32 = arith.constant 0 : i32
    %c0_i32_0 = arith.constant 0 : i32
    %c0_i32_1 = arith.constant 0 : i32
    return %c0_i32, %c0_i32_0 : i32, i32
  }
  func.func @transform_13(%arg0: i32) -> (i32, i32) {
    %c0_i32 = arith.constant 0 : i32
    %c0_i32_0 = arith.constant 0 : i32
    %c0_i32_1 = arith.constant 0 : i32
    return %c0_i32, %c0_i32_0 : i32, i32
  }
  func.func @transform_14(%arg0: i32) -> (i32, i32) {
    %c0_i32 = arith.constant 0 : i32
    %c0_i32_0 = arith.constant 0 : i32
    %c0_i32_1 = arith.constant 0 : i32
    return %c0_i32, %c0_i32_0 : i32, i32
  }
  func.func @transform_15(%arg0: i32) -> (i32, i32) {
    %c0_i32 = arith.constant 0 : i32
    %c0_i32_0 = arith.constant 0 : i32
    %c0_i32_1 = arith.constant 0 : i32
    return %c0_i32, %c0_i32_0 : i32, i32
  }
  func.func @transform_16(%arg0: i32) -> (i32, i32) {
    %c0_i32 = arith.constant 0 : i32
    %c0_i32_0 = arith.constant 0 : i32
    %c0_i32_1 = arith.constant 0 : i32
    return %c0_i32, %c0_i32_0 : i32, i32
  }
}

</mosaic_0001>

<bundles_post_ra>
// kernel: tpu_custom_call.1
= control target key start
LH: loop header
LB: loop body
LE: loop exit
PB: predicated region body
PF: predicated region fallthrough
CT: control target
= control target key end

     0   :  { %vm1838_vm3 = vmmov 1   ;;  %v1839_v8 = vmov 0.0   ;;  %s1840_s24 = smov 32   ;;  %s3301_s0 = inlined_call_operand.vmem [shape: f32[128,32], index: 0, kind: input, shape index: {}]   ;;  %s3302_s2 = inlined_call_operand.vmem [shape: f32[64,32], index: 2, kind: input, shape index: {}]   ;;  %s3303_s3 = inlined_call_operand.vmem [shape: f32[1,32], index: 3, kind: input, shape index: {}]   ;;  %s3304_s6 = inlined_call_operand.vmem [shape: f32[32,32], index: 6, kind: input, shape index: {}]   ;;  %s3305_s4 = inlined_call_operand.vmem [shape: f32[1,32], index: 4, kind: input, shape index: {}]   ;;  %s3306_s5 = inlined_call_operand.vmem [shape: f32[1,32], index: 5, kind: input, shape index: {}]   ;;  %s3307_s1 = inlined_call_operand.vmem [shape: f32[3,128,32], index: 1, kind: input, shape index: {}]   ;;  %s3308_s7 = inlined_call_operand.vmem [shape: f32[1,32], index: 7, kind: input, shape index: {}]   ;;  %s3309_s10 = inlined_call_operand.vmem [shape: f32[32,32], index: 10, kind: input, shape index: {}]   ;;  %s3310_s8 = inlined_call_operand.vmem [shape: f32[1,32], index: 8, kind: input, shape index: {}]   ;;  %s3311_s9 = inlined_call_operand.vmem [shape: f32[1,32], index: 9, kind: input, shape index: {}]   ;;  %s3312_s11 = inlined_call_operand.vmem [shape: f32[1,32], index: 11, kind: input, shape index: {}]   ;;  %s3313_s14 = inlined_call_operand.vmem [shape: f32[32,32], index: 14, kind: input, shape index: {}]   ;;  %s3314_s12 = inlined_call_operand.vmem [shape: f32[1,32], index: 12, kind: input, shape index: {}]   ;;  %s3315_s13 = inlined_call_operand.vmem [shape: f32[1,32], index: 13, kind: input, shape index: {}]   ;;  %s3316_s15 = inlined_call_operand.vmem [shape: f32[1,32], index: 15, kind: input, shape index: {}]   ;;  %s3317_s16 = inlined_call_operand.vmem [shape: f32[128,32], index: 16, kind: output, shape index: {}]  }
   0x1   :  { %3322 = sst [smem:[#allocation2_spill]] %s3301_s0  ;;  %v237_v20 = vld [vmem:[%s3302_s2 + $0x38] sm:$0xff]  ;;  %v236_v21 = vld [vmem:[%s3302_s2 + $0x30] sm:$0xff]  ;;  %v235_v28 = vld [vmem:[%s3302_s2 + $0x28] sm:$0xff] }
   0x2   :  { %s3323_s23 = sld [smem:[#allocation2_spill]]  ;;  %299 = vmatpush.msra.mxu0 %v237_v20  ;;  %v234_v36 = vld [vmem:[%s3302_s2 + $0x20] sm:$0xff]  ;;  %v233_v43 = vld [vmem:[%s3302_s2 + $0x18] sm:$0xff]  ;;  %v232_v48 = vld [vmem:[%s3302_s2 + $0x10] sm:$0xff] }
   0x3   :  { %v231_v54 = vld [vmem:[%s3302_s2 + $0x8] sm:$0xff] }
   0x4   :  { %300 = vmatpush.msra.mxu0 %v236_v21 }
   0x6   :  { %301 = vmatpush.msra.mxu0 %v235_v28 }
   0x8   :  { %v1929_v0 = vld [vmem:[%s3323_s23] sm:$0xff]  ;;  %v1934_v1 = vld [vmem:[%s3323_s23 + $0x8] sm:$0xff]  ;;  %v1939_v2 = vld [vmem:[%s3323_s23 + $0x10] sm:$0xff]  ;;  %302 = vmatpush.msra.mxu0 %v234_v36 }
   0x9   :  { %vm69_vm0 = vcmp.ne.f32.partialorder %v1929_v0, %v1929_v0  ;;  %vm70_vm1 = vcmp.ne.f32.partialorder %v1934_v1, %v1934_v1  ;;  %vm71_vm2 = vcmp.ne.f32.partialorder %v1939_v2, %v1939_v2  ;;  %v1950_v3 = vld [vmem:[%s3323_s23 + $0x18] sm:$0xff]  ;;  %v1955_v4 = vld [vmem:[%s3323_s23 + $0x30] sm:$0xff]  ;;  %v1960_v5 = vld [vmem:[%s3323_s23 + $0x20] sm:$0xff] }
   0xa   :  { %vm1963_vm4 = vmxor %vm69_vm0, %vm1838_vm3  ;;  %vm72_vm5 = vcmp.ne.f32.partialorder %v1950_v3, %v1950_v3  ;;  %v1972_v7 = vld [vmem:[%s3323_s23 + $0x38] sm:$0xff]  ;;  %vm75_vm7 = vcmp.ne.f32.partialorder %v1955_v4, %v1955_v4  ;;  %v1990_v12 = vld [vmem:[%s3323_s23 + $0x28] sm:$0xff]  ;;  %vm73_vm9 = vcmp.ne.f32.partialorder %v1960_v5, %v1960_v5  ;;  %303 = vmatpush.msra.mxu0 %v233_v43 }
   0xb   :  { %v1585_v9 = vsel %vm1963_vm4, 1.0, %v1839_v8  ;;  %v133_v10 = vsel %vm1963_vm4, %v1929_v0, 0.0  ;;  %vm1981_vm6 = vmxor %vm70_vm1, %vm1838_vm3  ;;  %v2009_v15 = vld [vmem:[%s3323_s23 + $0x48] sm:$0xff]  ;;  %v2014_v16 = vld [vmem:[%s3323_s23 + $0x50] sm:$0xff]  ;;  %vm76_vm11 = vcmp.ne.f32.partialorder %v1972_v7, %v1972_v7  ;;  %vm74_vm13 = vcmp.ne.f32.partialorder %v1990_v12, %v1990_v12 }
   0xc   :  { %165 = vrot.lane.b32.xlu0 %v1585_v9, %s1840_s24  ;;  %v134_v13 = vsel %vm1981_vm6, %v1934_v1, 0.0  ;;  %vm2000_vm8 = vmxor %vm71_vm2, %vm1838_vm3  ;;  %v2055_v24 = vld [vmem:[%s3323_s23 + $0x40] sm:$0xff]  ;;  %vm78_vm15 = vcmp.ne.f32.partialorder %v2009_v15, %v2009_v15  ;;  %vm79_vm1 = vcmp.ne.f32.partialorder %v2014_v16, %v2014_v16  ;;  %v2097_v32 = vld [vmem:[%s3323_s23 + $0x68] sm:$0xff]  ;;  %v1586_v33 = vsel %vm1981_vm6, 1.0, %v1839_v8  ;;  %304 = vmatpush.msra.mxu0 %v232_v48 }
   0xd   :  { %v1587_v17 = vsel %vm2000_vm8, 1.0, %v1839_v8  ;;  %v135_v18 = vsel %vm2000_vm8, %v1939_v2, 0.0  ;;  %vm2026_vm10 = vmxor %vm72_vm5, %vm1838_vm3  ;;  %v2073_v27 = vld [vmem:[%s3323_s23 + $0x60] sm:$0xff]  ;;  %vm77_vm5 = vcmp.ne.f32.partialorder %v2055_v24, %v2055_v24  ;;  %v2122_v37 = vld [vmem:[%s3323_s23 + $0x58] sm:$0xff] }
   0xe   :  { %169 = vrot.lane.b32.xlu1 %v1587_v17, %s1840_s24  ;;  %v136_v22 = vsel %vm2026_vm10, %v1950_v3, 0.0  ;;  %vm2046_vm12 = vmxor %vm75_vm7, %vm1838_vm3  ;;  %v1588_v40 = vsel %vm2026_vm10, 1.0, %v1839_v8  ;;  %305 = vmatpush.msra.mxu0 %v231_v54  ;;  %v230_v9 = vld [vmem:[%s3302_s2] sm:$0xff]  ;;  %v2243_v17 = vld [vmem:[%s3323_s23 + $0x78] sm:$0xff] }
   0xf   :  { %v139_v25 = vsel %vm2046_vm12, %v1955_v4, 0.0  ;;  %vm2064_vm14 = vmxor %vm73_vm9, %vm1838_vm3  ;;  %vm81_vm9 = vcmp.ne.f32.partialorder %v2073_v27, %v2073_v27  ;;  %v1591_v56 = vsel %vm2046_vm12, 1.0, %v1839_v8 }
  0x10   :  { %v1589_v29 = vsel %vm2064_vm14, 1.0, %v1839_v8  ;;  %v137_v30 = vsel %vm2064_vm14, %v1960_v5, 0.0  ;;  %vm2088_vm0 = vmxor %vm76_vm11, %vm1838_vm3  ;;  %306 = vmatpush.msra.mxu0 %v230_v9 }
  0x11   :  { %173 = vrot.lane.b32.xlu2 %v1589_v29, %s1840_s24  ;;  %v140_v34 = vsel %vm2088_vm0, %v1972_v7, 0.0  ;;  %vm2110_vm2 = vmxor %vm74_vm13, %vm1838_vm3  ;;  %vm82_vm13 = vcmp.ne.f32.partialorder %v2097_v32, %v2097_v32  ;;  %v1592_v57 = vsel %vm2088_vm0, 1.0, %v1839_v8  ;;  %v67_v29 = vld [vmem:[%s3323_s23 + $0x70] sm:$0xff] }
  0x12   :  { %v138_v38 = vsel %vm2110_vm2, %v1990_v12, 0.0  ;;  %vm2131_vm7 = vmxor %vm78_vm15, %vm1838_vm3  ;;  %v1590_v49 = vsel %vm2110_vm2, 1.0, %v1839_v8 }
  0x13   :  { %v142_v41 = vsel %vm2131_vm7, %v2009_v15, 0.0  ;;  %vm2147_vm11 = vmxor %vm79_vm1, %vm1838_vm3  ;;  %vm80_vm1 = vcmp.ne.f32.partialorder %v2122_v37, %v2122_v37  ;;  %v1594_v59 = vsel %vm2131_vm7, 1.0, %v1839_v8 }
  0x14   :  { %167 = vrot.lane.b32.xlu0 %v1586_v33, %s1840_s24  ;;  %v143_v44 = vsel %vm2147_vm11, %v2014_v16, 0.0  ;;  %vm2161_vm15 = vmxor %vm77_vm5, %vm1838_vm3  ;;  %v1595_v60 = vsel %vm2147_vm11, 1.0, %v1839_v8 }
  0x15   :  { %v141_v46 = vsel %vm2161_vm15, %v2055_v24, 0.0  ;;  %vm2171_vm14 = vmxor %vm81_vm9, %vm1838_vm3  ;;  %v1593_v58 = vsel %vm2161_vm15, 1.0, %v1839_v8 }
  0x16   :  { %171 = vrot.lane.b32.xlu1 %v1588_v40, %s1840_s24  ;;  %v145_v50 = vsel %vm2171_vm14, %v2073_v27, 0.0  ;;  %vm2186_vm5 = vmxor %vm82_vm13, %vm1838_vm3  ;;  %v1597_v62 = vsel %vm2171_vm14, 1.0, %v1839_v8  ;;  %vm84_vm13 = vcmp.ne.f32.partialorder %v2243_v17, %v2243_v17  ;;  %vm242_vm14 = vcmask 523264  }
  0x17   :  { %v146_v52 = vsel %vm2186_vm5, %v2097_v32, 0.0  ;;  %vm2194_vm9 = vmxor %vm80_vm1, %vm1838_vm3  ;;  %v1598_v63 = vsel %vm2186_vm5, 1.0, %v1839_v8  ;;  %vm83_vm5 = vcmp.ne.f32.partialorder %v67_v29, %v67_v29 }
  0x18   :  { %v144_v55 = vsel %vm2194_vm9, %v2122_v37, 0.0  ;;  %v1596_v61 = vsel %vm2194_vm9, 1.0, %v1839_v8  ;;  %vm2248_vm1 = vmxor %vm84_vm13, %vm1838_vm3 }
  0x19   :  { %175 = vrot.lane.b32.xlu2 %v1590_v49, %s1840_s24  ;;  %v1600_v21 = vsel %vm2248_vm1, 1.0, %v1839_v8  ;;  %v148_v28 = vsel %vm2248_vm1, %v2243_v17, 0.0  ;;  %vm2263_vm13 = vmxor %vm83_vm5, %vm1838_vm3  ;;  %vm213_vm1 = vcmask 261120  }
  0x1a   :  { %v1599_v36 = vsel %vm2263_vm13, 1.0, %v1839_v8  ;;  %v147_v40 = vsel %vm2263_vm13, %v67_v29, 0.0 }
  0x1c   :  { %177 = vrot.lane.b32.xlu0 %v1591_v56, %s1840_s24 }
  0x1e   :  { %179 = vrot.lane.b32.xlu1 %v1592_v57, %s1840_s24 }
  0x21   :  { %181 = vrot.lane.b32.xlu2 %v1593_v58, %s1840_s24 }
  0x24   :  { %183 = vrot.lane.b32.xlu0 %v1594_v59, %s1840_s24 }
  0x26   :  { %185 = vrot.lane.b32.xlu1 %v1595_v60, %s1840_s24 }
  0x29   :  { %187 = vrot.lane.b32.xlu2 %v1596_v61, %s1840_s24 }
  0x2c   :  { %189 = vrot.lane.b32.xlu0 %v1597_v62, %s1840_s24 }
  0x2e   :  { %191 = vrot.lane.b32.xlu1 %v1598_v63, %s1840_s24 }
  0x31   :  { %193 = vrot.lane.b32.xlu2 %v1599_v36, %s1840_s24 }
  0x34   :  { %195 = vrot.lane.b32.xlu0 %v1600_v21, %s1840_s24 }
  0x7e   :  { %v166_v43 = vpop.permute.xlu0 %165 }
  0x7f   :  { %v214_v48 = vsel %vm213_vm1, %v133_v10, %v166_v43  ;;  %v174_v10 = vpop.permute.xlu2 %173 }
  0x80   :  { %1601 = vmatmul.msk.f32.vlgmr.msra.gmra.mxu0 %vm242_vm14, %v214_v48  ;;  %v170_v54 = vpop.permute.xlu1 %169  ;;  %v218_v2 = vsel %vm213_vm1, %v137_v30, %v174_v10 }
  0x81   :  { %v216_v0 = vsel %vm213_vm1, %v135_v18, %v170_v54 }
  0x86   :  { %v168_v49 = vpop.permute.xlu0 %167 }
  0x87   :  { %v215_v8 = vsel %vm213_vm1, %v134_v13, %v168_v49  ;;  %v176_v11 = vpop.permute.xlu2 %175 }
  0x88   :  { %1602 = vmatmul.msk.f32.gmra.mxu0 %vm242_vm14, %v215_v8  ;;  %v172_v6 = vpop.permute.xlu1 %171  ;;  %v219_v3 = vsel %vm213_vm1, %v138_v38, %v176_v11 }
  0x89   :  { %v217_v1 = vsel %vm213_vm1, %v136_v22, %v172_v6 }
  0x8e   :  { %v178_v13 = vpop.permute.xlu0 %177 }
  0x8f   :  { %v220_v5 = vsel %vm213_vm1, %v139_v25, %v178_v13  ;;  %v182_v18 = vpop.permute.xlu2 %181 }
  0x90   :  { %1603 = vmatmul.msk.f32.gmra.mxu0 %vm242_vm14, %v216_v0  ;;  %v180_v14 = vpop.permute.xlu1 %179  ;;  %v222_v4 = vsel %vm213_vm1, %v141_v46, %v182_v18 }
  0x91   :  { %v221_v12 = vsel %vm213_vm1, %v140_v34, %v180_v14 }
  0x96   :  { %v184_v19 = vpop.permute.xlu0 %183 }
  0x97   :  { %v223_v7 = vsel %vm213_vm1, %v142_v41, %v184_v19  ;;  %v188_v24 = vpop.permute.xlu2 %187 }
  0x98   :  { %1604 = vmatmul.msk.f32.gmra.mxu0 %vm242_vm14, %v217_v1  ;;  %v186_v22 = vpop.permute.xlu1 %185  ;;  %v225_v15 = vsel %vm213_vm1, %v144_v55, %v188_v24 }
  0x99   :  { %v224_v23 = vsel %vm213_vm1, %v143_v44, %v186_v22 }
  0x9e   :  { %v190_v25 = vpop.permute.xlu0 %189 }
  0x9f   :  { %v226_v16 = vsel %vm213_vm1, %v145_v50, %v190_v25  ;;  %v194_v31 = vpop.permute.xlu2 %193  ;;  %v2364_v50 = vld [vmem:[%s3303_s3] ss:$0 sm:$0xff] }
  0xa0   :  { %1605 = vmatmul.msk.f32.gmra.mxu0 %vm242_vm14, %v218_v2  ;;  %v192_v26 = vpop.permute.xlu1 %191  ;;  %v228_v34 = vsel %vm213_vm1, %v147_v40, %v194_v31 }
  0xa1   :  { %v227_v30 = vsel %vm213_vm1, %v146_v52, %v192_v26 }
  0xa6   :  { %v196_v35 = vpop.permute.xlu0 %195 }
  0xa7   :  { %v229_v27 = vsel %vm213_vm1, %v148_v28, %v196_v35 }
  0xa8   :  { %1606 = vmatmul.msk.f32.gmra.mxu0 %vm242_vm14, %v219_v3 }
  0xb0   :  { %1607 = vmatmul.msk.f32.gmra.mxu0 %vm242_vm14, %v220_v5 }
  0xb8   :  { %1608 = vmatmul.msk.f32.gmra.mxu0 %vm242_vm14, %v221_v12 }
  0xc0   :  { %1609 = vmatmul.msk.f32.gmra.mxu0 %vm242_vm14, %v222_v4 }
  0xc8   :  { %1610 = vmatmul.msk.f32.gmra.mxu0 %vm242_vm14, %v223_v7 }
  0xd0   :  { %1611 = vmatmul.msk.f32.gmra.mxu0 %vm242_vm14, %v224_v23 }
  0xd8   :  { %1612 = vmatmul.msk.f32.gmra.mxu0 %vm242_vm14, %v225_v15 }
  0xe0   :  { %1613 = vmatmul.msk.f32.gmra.mxu0 %vm242_vm14, %v226_v16 }
  0xe8   :  { %1614 = vmatmul.msk.f32.gmra.mxu0 %vm242_vm14, %v227_v30 }
  0xf0   :  { %1615 = vmatmul.msk.f32.gmra.mxu0 %vm242_vm14, %v228_v34 }
  0xf8   :  { %1616 = vmatmul.msk.f32.gmra.mxu0 %vm242_vm14, %v229_v27 }
  0xfd   :  { %v308_v37 = vpop.f32.mrf.mxu0 }
  0xfe   :  { %v309_v52 = vadd.f32 %v2364_v50, %v308_v37 }
 0x100   :  { %v356_v57 = vmul.f32 0.5, %v309_v52 }
 0x105   :  { %v311_v38 = vpop.f32.mrf.mxu0 }
 0x106   :  { %v312_v51 = vadd.f32 %v2364_v50, %v311_v38 }
 0x108   :  { %v357_v56 = vmul.f32 0.5, %v312_v51 }
 0x10a   :  { %1704 = vtanh.f32 %v357_v56 }
 0x10b   :  { %1706 = vtanh.f32 %v356_v57 }
 0x10d   :  { %v314_v39 = vpop.f32.mrf.mxu0 }
 0x10e   :  { %v315_v55 = vadd.f32 %v2364_v50, %v314_v39 }
 0x110   :  { %v358_v59 = vmul.f32 0.5, %v315_v55  ;;  %v1705_v28 = vpop.eup %1704 }
 0x111   :  { %v1707_v33 = vpop.eup %1706  ;;  %v389_v48 = vmul.f32 0.5, %v1705_v28 }
 0x112   :  { %1708 = vtanh.f32 %v358_v59  ;;  %v388_v8 = vmul.f32 0.5, %v1707_v33 }
 0x113   :  { %v2377_v3 = vadd.f32 0.5, %v389_v48 }
 0x114   :  { %v2380_v5 = vadd.f32 0.5, %v388_v8 }
 0x115   :  { %v317_v41 = vpop.f32.mrf.mxu0  ;;  %v461_v23 = vmul.f32 %v2377_v3, %v2377_v3  ;;  %v423_v27 = vsel %vm213_vm1, %v2377_v3, 0.0 }
 0x116   :  { %v318_v58 = vadd.f32 %v2364_v50, %v317_v41  ;;  %v460_v15 = vmul.f32 %v2380_v5, %v2380_v5  ;;  %v422_v41 = vsel %vm213_vm1, %v2380_v5, 0.0 }
 0x118   :  { %v359_v61 = vmul.f32 0.5, %v318_v58  ;;  %v1709_v43 = vpop.eup %1708  ;;  %v476_v52 = vsel %vm213_vm1, %v460_v15, 0.0 }
 0x119   :  { %v390_v10 = vmul.f32 0.5, %v1709_v43 }
 0x11a   :  { %1710 = vtanh.f32 %v359_v61 }
 0x11b   :  { %v2383_v7 = vadd.f32 0.5, %v390_v10 }
 0x11d   :  { %v320_v42 = vpop.f32.mrf.mxu0  ;;  %v462_v37 = vmul.f32 %v2383_v7, %v2383_v7 }
 0x11e   :  { %v321_v60 = vadd.f32 %v2364_v50, %v320_v42  ;;  %v477_v42 = vsel %vm213_vm1, %v461_v23, 0.0 }
 0x11f   :  { %v479_v56 = vsel %vm213_vm1, %v462_v37, 0.0  ;;  %v478_v61 = vadd.f32 %v477_v42, %v476_v52 }
 0x120   :  { %v360_v17 = vmul.f32 0.5, %v321_v60  ;;  %v1711_v0 = vpop.eup %1710 }
 0x121   :  { %v391_v14 = vmul.f32 0.5, %v1711_v0  ;;  %v480_v33 = vadd.f32 %v479_v56, %v478_v61 }
 0x122   :  { %1712 = vtanh.f32 %v360_v17 }
 0x123   :  { %v2389_v25 = vadd.f32 0.5, %v391_v14 }
 0x125   :  { %v323_v32 = vpop.f32.mrf.mxu0  ;;  %v427_v57 = vsel %vm213_vm1, %v2389_v25, 0.0 }
 0x126   :  { %v324_v62 = vadd.f32 %v2364_v50, %v323_v32 }
 0x128   :  { %v361_v20 = vmul.f32 0.5, %v324_v62  ;;  %v1713_v11 = vpop.eup %1712 }
 0x129   :  { %v392_v22 = vmul.f32 0.5, %v1713_v11 }
 0x12a   :  { %1714 = vtanh.f32 %v361_v20 }
 0x12b   :  { %v2396_v38 = vadd.f32 0.5, %v392_v22 }
 0x12d   :  { %v326_v44 = vpop.f32.mrf.mxu0  ;;  %v464_v58 = vmul.f32 %v2396_v38, %v2396_v38  ;;  %v429_v17 = vsel %vm213_vm1, %v2396_v38, 0.0 }
 0x12e   :  { %v327_v63 = vadd.f32 %v2364_v50, %v326_v44 }
 0x12f   :  { %v483_v48 = vsel %vm213_vm1, %v464_v58, 0.0 }
 0x130   :  { %v362_v29 = vmul.f32 0.5, %v327_v63  ;;  %v1715_v12 = vpop.eup %1714 }
 0x131   :  { %v393_v16 = vmul.f32 0.5, %v1715_v12 }
 0x132   :  { %1716 = vtanh.f32 %v362_v29 }
 0x135   :  { %v329_v45 = vpop.f32.mrf.mxu0 }
 0x136   :  { %v330_v21 = vadd.f32 %v2364_v50, %v329_v45  ;;  %v425_v45 = vsel %vm213_vm1, %v2383_v7, 0.0 }
 0x138   :  { %v363_v49 = vmul.f32 0.5, %v330_v21  ;;  %v1717_v19 = vpop.eup %1716 }
 0x139   :  { %v394_v31 = vmul.f32 0.5, %v1717_v19 }
 0x13a   :  { %1718 = vtanh.f32 %v363_v49 }
 0x13b   :  { %v2408_v55 = vadd.f32 0.5, %v394_v31 }
 0x13d   :  { %v332_v46 = vpop.f32.mrf.mxu0 }
 0x13e   :  { %v333_v36 = vadd.f32 %v2364_v50, %v332_v46  ;;  %v463_v46 = vmul.f32 %v2389_v25, %v2389_v25 }
 0x140   :  { %v364_v6 = vmul.f32 0.5, %v333_v36  ;;  %v1719_v30 = vpop.eup %1718 }
 0x141   :  { %v395_v51 = vmul.f32 0.5, %v1719_v30 }
 0x142   :  { %1720 = vtanh.f32 %v364_v6 }
 0x143   :  { %v2420_v21 = vadd.f32 0.5, %v395_v51 }
 0x145   :  { %v335_v47 = vpop.f32.mrf.mxu0  ;;  %v467_v14 = vmul.f32 %v2420_v21, %v2420_v21  ;;  %v435_v23 = vsel %vm213_vm1, %v2420_v21, 0.0 }
 0x146   :  { %v336_v40 = vadd.f32 %v2364_v50, %v335_v47  ;;  %v2405_v47 = vadd.f32 0.5, %v393_v16 }
 0x148   :  { %v365_v2 = vmul.f32 0.5, %v336_v40  ;;  %v1721_v39 = vpop.eup %1720  ;;  %v465_v20 = vmul.f32 %v2405_v47, %v2405_v47  ;;  %v466_v40 = vmul.f32 %v2408_v55, %v2408_v55  ;;  %v431_v49 = vsel %vm213_vm1, %v2405_v47, 0.0 }
 0x149   :  { %v396_v59 = vmul.f32 0.5, %v1721_v39 }
 0x14a   :  { %1722 = vtanh.f32 %v365_v2  ;;  %v485_v11 = vsel %vm213_vm1, %v465_v20, 0.0  ;;  %v487_v22 = vsel %vm213_vm1, %v466_v40, 0.0 }
 0x14b   :  { %v2428_v8 = vadd.f32 0.5, %v396_v59 }
 0x14d   :  { %v338_v53 = vpop.f32.mrf.mxu0 }
 0x14e   :  { %v339_v1 = vadd.f32 %v2364_v50, %v338_v53  ;;  %v424_v53 = vadd.f32 %v423_v27, %v422_v41 }
 0x150   :  { %v366_v18 = vmul.f32 0.5, %v339_v1  ;;  %v1723_v44 = vpop.eup %1722  ;;  %v426_v62 = vadd.f32 %v425_v45, %v424_v53 }
 0x151   :  { %v397_v63 = vmul.f32 0.5, %v1723_v44 }
 0x152   :  { %1724 = vtanh.f32 %v366_v18  ;;  %v428_v36 = vadd.f32 %v427_v57, %v426_v62 }
 0x153   :  { %v2430_v10 = vadd.f32 0.5, %v397_v63 }
 0x154   :  { %v430_v1 = vadd.f32 %v429_v17, %v428_v36 }
 0x155   :  { %v341_v9 = vpop.f32.mrf.mxu0  ;;  %v469_v31 = vmul.f32 %v2430_v10, %v2430_v10  ;;  %v439_v45 = vsel %vm213_vm1, %v2430_v10, 0.0 }
 0x156   :  { %v342_v13 = vadd.f32 %v2364_v50, %v341_v9  ;;  %v481_v9 = vsel %vm213_vm1, %v463_v46, 0.0  ;;  %v432_v19 = vadd.f32 %v431_v49, %v430_v1 }
 0x157   :  { %v482_v6 = vadd.f32 %v481_v9, %v480_v33  ;;  %v493_v57 = vsel %vm213_vm1, %v469_v31, 0.0 }
 0x158   :  { %v367_v24 = vmul.f32 0.5, %v342_v13  ;;  %v1725_v60 = vpop.eup %1724  ;;  %v433_v13 = vsel %vm213_vm1, %v2408_v55, 0.0 }
 0x159   :  { %v434_v30 = vadd.f32 %v433_v13, %v432_v19 }
 0x15a   :  { %1726 = vtanh.f32 %v367_v24  ;;  %v468_v24 = vmul.f32 %v2428_v8, %v2428_v8 }
 0x15b   :  { %v436_v42 = vadd.f32 %v435_v23, %v434_v30 }
 0x15c   :  { %v491_v44 = vsel %vm213_vm1, %v468_v24, 0.0 }
 0x15d   :  { %v344_v54 = vpop.f32.mrf.mxu0 }
 0x15e   :  { %v345_v4 = vadd.f32 %v2364_v50, %v344_v54  ;;  %v398_v54 = vmul.f32 0.5, %v1725_v60 }
 0x160   :  { %v368_v34 = vmul.f32 0.5, %v345_v4  ;;  %v1727_v29 = vpop.eup %1726  ;;  %v484_v4 = vadd.f32 %v483_v48, %v482_v6  ;;  %v2442_v15 = vadd.f32 0.5, %v398_v54 }
 0x161   :  { %v399_v12 = vmul.f32 0.5, %v1727_v29 }
 0x162   :  { %1728 = vtanh.f32 %v368_v34  ;;  %v489_v34 = vsel %vm213_vm1, %v467_v14, 0.0  ;;  %v470_v46 = vmul.f32 %v2442_v15, %v2442_v15  ;;  %v441_v59 = vsel %vm213_vm1, %v2442_v15, 0.0 }
 0x163   :  { %v2449_v27 = vadd.f32 0.5, %v399_v12 }
 0x164   :  { %v495_v9 = vsel %vm213_vm1, %v470_v46, 0.0 }
 0x165   :  { %v347_v26 = vpop.f32.mrf.mxu0  ;;  %v443_v17 = vsel %vm213_vm1, %v2449_v27, 0.0 }
 0x166   :  { %v348_v35 = vadd.f32 %v2364_v50, %v347_v26  ;;  %v486_v26 = vadd.f32 %v485_v11, %v484_v4 }
 0x168   :  { %v369_v32 = vmul.f32 0.5, %v348_v35  ;;  %v1729_v0 = vpop.eup %1728  ;;  %v437_v35 = vsel %vm213_vm1, %v2428_v8, 0.0  ;;  %v488_v41 = vadd.f32 %v487_v22, %v486_v26 }
 0x169   :  { %v400_v16 = vmul.f32 0.5, %v1729_v0  ;;  %v438_v56 = vadd.f32 %v437_v35, %v436_v42 }
 0x16a   :  { %1730 = vtanh.f32 %v369_v32  ;;  %v490_v53 = vadd.f32 %v489_v34, %v488_v41 }
 0x16b   :  { %v2457_v51 = vadd.f32 0.5, %v400_v16  ;;  %v440_v63 = vadd.f32 %v439_v45, %v438_v56 }
 0x16c   :  { %v492_v62 = vadd.f32 %v491_v44, %v490_v53 }
 0x16d   :  { %v350_v28 = vpop.f32.mrf.mxu0  ;;  %v472_v20 = vmul.f32 %v2457_v51, %v2457_v51  ;;  %v442_v33 = vadd.f32 %v441_v59, %v440_v63  ;;  %v445_v40 = vsel %vm213_vm1, %v2457_v51, 0.0 }
 0x16e   :  { %v351_v43 = vadd.f32 %v2364_v50, %v350_v28  ;;  %v494_v29 = vadd.f32 %v493_v57, %v492_v62  ;;  %v635_v57 = vld [vmem:[%s3304_s6 + $0x18] sm:$0xff] }
 0x16f   :  { %v444_v49 = vadd.f32 %v443_v17, %v442_v33  ;;  %v499_v54 = vsel %vm213_vm1, %v472_v20, 0.0  ;;  %700 = vmatpush.msra.mxu1 %v635_v57 }
 0x170   :  { %v370_v2 = vmul.f32 0.5, %v351_v43  ;;  %v1731_v18 = vpop.eup %1730  ;;  %v496_v48 = vadd.f32 %v495_v9, %v494_v29  ;;  %v632_v9 = vld [vmem:[%s3304_s6] sm:$0xff] }
 0x171   :  { %v401_v37 = vmul.f32 0.5, %v1731_v18  ;;  %v446_v11 = vadd.f32 %v445_v40, %v444_v49 }
 0x172   :  { %1732 = vtanh.f32 %v370_v2 }
 0x173   :  { %v2464_v60 = vadd.f32 0.5, %v401_v37 }
 0x175   :  { %v353_v39 = vpop.f32.mrf.mxu0  ;;  %v473_v43 = vmul.f32 %v2464_v60, %v2464_v60  ;;  %v447_v0 = vsel %vm213_vm1, %v2464_v60, 0.0 }
 0x176   :  { %v354_v32 = vadd.f32 %v2364_v50, %v353_v39  ;;  %v471_v50 = vmul.f32 %v2449_v27, %v2449_v27  ;;  %v448_v4 = vadd.f32 %v447_v0, %v446_v11 }
 0x177   :  { %v501_v13 = vsel %vm213_vm1, %v473_v43, 0.0 }
 0x178   :  { %v1733_v52 = vpop.eup %1732  ;;  %v371_v58 = vmul.f32 0.5, %v354_v32  ;;  %v497_v36 = vsel %vm213_vm1, %v471_v50, 0.0  ;;  %v634_v50 = vld [vmem:[%s3304_s6 + $0x10] sm:$0xff] }
 0x179   :  { %v402_v61 = vmul.f32 0.5, %v1733_v52  ;;  %v498_v2 = vadd.f32 %v497_v36, %v496_v48  ;;  %701 = vmatpush.msra.mxu1 %v634_v50  ;;  %v420_v48 = vld [vmem:[%s3305_s4] sm:$0x1] }
 0x17a   :  { %1734 = vtanh.f32 %v371_v58 }
 0x17b   :  { %v2471_v28 = vadd.f32 0.5, %v402_v61  ;;  %v500_v18 = vadd.f32 %v499_v54, %v498_v2  ;;  %v633_v61 = vld [vmem:[%s3304_s6 + $0x8] sm:$0xff] }
 0x17c   :  { %702 = vmatpush.msra.mxu1 %v633_v61 }
 0x17d   :  { %v474_v6 = vmul.f32 %v2471_v28, %v2471_v28  ;;  %v449_v14 = vsel %vm213_vm1, %v2471_v28, 0.0  ;;  %v502_v23 = vadd.f32 %v501_v13, %v500_v18 }
 0x17e   :  { %v450_v24 = vadd.f32 %v449_v14, %v448_v4  ;;  %703 = vmatpush.msra.mxu1 %v632_v9 }
 0x17f   :  { %v503_v19 = vsel %vm213_vm1, %v474_v6, 0.0  ;;  %v421_v6 = vld [vmem:[%s3306_s5] sm:$0x1] }
 0x180   :  { %v1735_v1 = vpop.eup %1734  ;;  %v504_v30 = vadd.f32 %v503_v19, %v502_v23 }
 0x181   :  { %v403_v12 = vmul.f32 0.5, %v1735_v1 }
 0x183   :  { %v2487_v22 = vadd.f32 0.5, %v403_v12  ;;  %v568_v12 = vld [vmem:[%s3307_s1] sm:$0xff] }
 0x184   :  { %vm584_vm14 = vcmp.lt.f32.partialorder %v568_v12, 0.5  ;;  %v579_v12 = vld [vmem:[%s3307_s1 + $0x58] sm:$0xff] }
 0x185   :  { %v451_v16 = vsel %vm213_vm1, %v2487_v22, 0.0  ;;  %v475_v26 = vmul.f32 %v2487_v22, %v2487_v22  ;;  %vm595_vm6 = vcmp.lt.f32.partialorder %v579_v12, 0.5 }
 0x186   :  { %v452_v31 = vadd.f32 %v451_v16, %v450_v24 }
 0x187   :  { %v505_v34 = vsel %vm213_vm1, %v475_v26, 0.0 }
 0x188   :  { %v453_v35 = vrot.slane %v452_v31, 4  ;;  %v506_v37 = vadd.f32 %v505_v34, %v504_v30 }
 0x18a   :  { %v454_v39 = vadd.f32 %v453_v35, %v452_v31  ;;  %v507_v41 = vrot.slane %v506_v37, 4 }
 0x18c   :  { %v455_v42 = vrot.slane %v454_v39, 2  ;;  %v508_v32 = vadd.f32 %v507_v41, %v506_v37 }
 0x18e   :  { %v456_v44 = vadd.f32 %v455_v42, %v454_v39  ;;  %v509_v45 = vrot.slane %v508_v32, 2 }
 0x190   :  { %v457_v46 = vrot.slane %v456_v44, 1  ;;  %v510_v52 = vadd.f32 %v509_v45, %v508_v32 }
 0x192   :  { %v458_v53 = vadd.f32 %v457_v46, %v456_v44  ;;  %v511_v56 = vrot.slane %v510_v52, 1 }
 0x194   :  { %v459_v58 = vmul.f32 0.0078125, %v458_v53  ;;  %v512_v59 = vadd.f32 %v511_v56, %v510_v52 }
 0x196   :  { %v513_v62 = vmul.f32 0.0078125, %v512_v59  ;;  %v514_v63 = vmul.f32 %v459_v58, %v459_v58 }
 0x198   :  { %v515_v17 = vsub.f32 %v513_v62, %v514_v63 }
 0x19a   :  { %v516_v20 = vadd.f32 1e-05, %v515_v17 }
 0x19c   :  { %1736 = vrsqrt.f32 %v516_v20  ;;  %vm523_vm10 = vweird.f32 %v516_v20 }
 0x1a2   :  { %v1737_v29 = vpop.eup %1736 }
 0x1a3   :  { %v518_v33 = vmul.f32 %v1737_v29, %v516_v20  ;;  %vm524_vm8 = vweird.f32 %v1737_v29 }
 0x1a4   :  { %vm525_vm12 = vmor %vm523_vm10, %vm524_vm8 }
 0x1a5   :  { %v519_v36 = vmul.f32 %v1737_v29, %v518_v33 }
 0x1a7   :  { %v520_v40 = vmul.f32 0.5, %v519_v36 }
 0x1a9   :  { %v521_v43 = vsub.f32 1.5, %v520_v40 }
 0x1ab   :  { %v522_v49 = vmul.f32 %v1737_v29, %v521_v43 }
 0x1ad   :  { %v526_v54 = vsel %vm525_vm12, %v1737_v29, %v522_v49 }
 0x1ae   :  { %v527_v0 = vmul.f32 %v526_v54, %v420_v48  ;;  %v576_v54 = vld [vmem:[%s3307_s1 + $0x40] sm:$0xff] }
 0x1af   :  { %vm592_vm13 = vcmp.lt.f32.partialorder %v576_v54, 0.5 }
 0x1b0   :  { %v528_v1 = vmul.f32 %v527_v0, %v459_v58  ;;  %v2512_v2 = vperm.slane %v527_v0, 0 }
 0x1b2   :  { %v529_v11 = vsub.f32 %v421_v6, %v528_v1  ;;  %v533_v14 = vmul.f32 %v2512_v2, %v2380_v5  ;;  %v546_v18 = vmul.f32 %v2512_v2, %v2464_v60  ;;  %v534_v23 = vmul.f32 %v2512_v2, %v2377_v3  ;;  %v577_v6 = vld [vmem:[%s3307_s1 + $0x48] sm:$0xff] }
 0x1b3   :  { %v541_v24 = vmul.f32 %v2512_v2, %v2428_v8  ;;  %v542_v5 = vmul.f32 %v2512_v2, %v2430_v10  ;;  %v543_v30 = vmul.f32 %v2512_v2, %v2442_v15  ;;  %v544_v60 = vmul.f32 %v2512_v2, %v2449_v27  ;;  %v569_v8 = vld [vmem:[%s3307_s1 + $0x8] sm:$0xff] }
 0x1b4   :  { %v2514_v13 = vperm.slane %v529_v11, 0  ;;  %v545_v3 = vmul.f32 %v2512_v2, %v2457_v51  ;;  %v547_v51 = vmul.f32 %v2512_v2, %v2471_v28  ;;  %v548_v37 = vmul.f32 %v2512_v2, %v2487_v22  ;;  %v570_v28 = vld [vmem:[%s3307_s1 + $0x10] sm:$0xff] }
 0x1b5   :  { %vm585_vm0 = vcmp.lt.f32.partialorder %v569_v8, 0.5  ;;  %v535_v32 = vmul.f32 %v2512_v2, %v2383_v7  ;;  %vm586_vm2 = vcmp.lt.f32.partialorder %v570_v28, 0.5  ;;  %v536_v46 = vmul.f32 %v2512_v2, %v2389_v25  ;;  %v571_v7 = vld [vmem:[%s3307_s1 + $0x18] sm:$0xff]  ;;  %v572_v25 = vld [vmem:[%s3307_s1 + $0x20] sm:$0xff]  ;;  %v578_v11 = vld [vmem:[%s3307_s1 + $0x50] sm:$0xff] }
 0x1b6   :  { %v552_v4 = vadd.f32 %v2514_v13, %v533_v14  ;;  %v553_v26 = vadd.f32 %v2514_v13, %v534_v23  ;;  %v560_v10 = vadd.f32 %v2514_v13, %v541_v24  ;;  %v561_v31 = vadd.f32 %v2514_v13, %v542_v5  ;;  %v581_v5 = vld [vmem:[%s3307_s1 + $0x68] sm:$0xff]  ;;  %v583_v8 = vld [vmem:[%s3307_s1 + $0x78] sm:$0xff] }
 0x1b7   :  { %v2544_v34 = vadd.f32 %v2514_v13, %v543_v30  ;;  %v2547_v15 = vadd.f32 %v2514_v13, %v544_v60  ;;  %v2550_v27 = vadd.f32 %v2514_v13, %v545_v3  ;;  %v2553_v35 = vadd.f32 %v2514_v13, %v546_v18  ;;  %v582_v30 = vld [vmem:[%s3307_s1 + $0x70] sm:$0xff] }
 0x1b8   :  { %v600_v19 = vmul.f32 2.0, %v552_v4  ;;  %v601_v39 = vmul.f32 2.0, %v553_v26  ;;  %v2560_v41 = vadd.f32 %v2514_v13, %v547_v51  ;;  %v2563_v42 = vadd.f32 %v2514_v13, %v548_v37 }
 0x1b9   :  { %v554_v45 = vadd.f32 %v2514_v13, %v535_v32  ;;  %v555_v53 = vadd.f32 %v2514_v13, %v536_v46  ;;  %vm587_vm7 = vcmp.lt.f32.partialorder %v571_v7, 0.5  ;;  %v537_v57 = vmul.f32 %v2512_v2, %v2396_v38  ;;  %v573_v38 = vld [vmem:[%s3307_s1 + $0x28] sm:$0xff] }
 0x1ba   :  { %v616_v16 = vsel %vm584_vm14, %v600_v19, 0.0  ;;  %v617_v44 = vsel %vm585_vm0, %v601_v39, 0.0  ;;  %vm588_vm11 = vcmp.lt.f32.partialorder %v572_v25, 0.5  ;;  %v538_v61 = vmul.f32 %v2512_v2, %v2405_v47  ;;  %v574_v47 = vld [vmem:[%s3307_s1 + $0x30] sm:$0xff]  ;;  %v580_v19 = vld [vmem:[%s3307_s1 + $0x60] sm:$0xff] }
 0x1bb   :  { %1617 = vmatmul.msk.f32.vlgmr.msra.gmra.mxu1 %vm213_vm1, %v616_v16  ;;  %v602_v22 = vmul.f32 2.0, %v554_v45  ;;  %v603_v56 = vmul.f32 2.0, %v555_v53  ;;  %v556_v59 = vadd.f32 %v2514_v13, %v537_v57  ;;  %vm589_vm15 = vcmp.lt.f32.partialorder %v573_v38, 0.5  ;;  %v2649_v45 = vld [vmem:[%s3308_s7] ss:$0 sm:$0xff] }
 0x1bc   :  { %v557_v63 = vadd.f32 %v2514_v13, %v538_v61  ;;  %v539_v17 = vmul.f32 %v2512_v2, %v2408_v55  ;;  %vm590_vm5 = vcmp.lt.f32.partialorder %v574_v47, 0.5  ;;  %v540_v36 = vmul.f32 %v2512_v2, %v2420_v21  ;;  %v575_v55 = vld [vmem:[%s3307_s1 + $0x38] sm:$0xff] }
 0x1bd   :  { %v618_v52 = vsel %vm586_vm2, %v602_v22, 0.0  ;;  %v619_v58 = vsel %vm587_vm7, %v603_v56, 0.0  ;;  %v604_v50 = vmul.f32 2.0, %v556_v59  ;;  %vm591_vm9 = vcmp.lt.f32.partialorder %v575_v55, 0.5 }
 0x1be   :  { %v605_v9 = vmul.f32 2.0, %v557_v63  ;;  %v558_v29 = vadd.f32 %v2514_v13, %v539_v17  ;;  %v559_v43 = vadd.f32 %v2514_v13, %v540_v36  ;;  %v608_v0 = vmul.f32 2.0, %v560_v10 }
 0x1bf   :  { %v620_v62 = vsel %vm588_vm11, %v604_v50, 0.0  ;;  %v609_v1 = vmul.f32 2.0, %v561_v31  ;;  %vm593_vm3 = vcmp.lt.f32.partialorder %v577_v6, 0.5  ;;  %v610_v13 = vmul.f32 2.0, %v2544_v34 }
 0x1c0   :  { %v621_v20 = vsel %vm589_vm15, %v605_v9, 0.0  ;;  %v606_v33 = vmul.f32 2.0, %v558_v29  ;;  %v607_v48 = vmul.f32 2.0, %v559_v43  ;;  %v624_v21 = vsel %vm592_vm13, %v608_v0, 0.0 }
 0x1c1   :  { %v625_v2 = vsel %vm593_vm3, %v609_v1, 0.0  ;;  %vm594_vm4 = vcmp.lt.f32.partialorder %v578_v11, 0.5  ;;  %v611_v18 = vmul.f32 2.0, %v2547_v15  ;;  %v612_v23 = vmul.f32 2.0, %v2550_v27 }
 0x1c2   :  { %v622_v40 = vsel %vm590_vm5, %v606_v33, 0.0  ;;  %v623_v49 = vsel %vm591_vm9, %v607_v48, 0.0  ;;  %v626_v14 = vsel %vm594_vm4, %v610_v13, 0.0  ;;  %vm596_vm8 = vcmp.lt.f32.partialorder %v580_v19, 0.5 }
 0x1c3   :  { %1618 = vmatmul.msk.f32.gmra.mxu1 %vm213_vm1, %v617_v44  ;;  %v627_v4 = vsel %vm595_vm6, %v611_v18, 0.0  ;;  %v628_v24 = vsel %vm596_vm8, %v612_v23, 0.0  ;;  %v613_v16 = vmul.f32 2.0, %v2553_v35  ;;  %vm597_vm10 = vcmp.lt.f32.partialorder %v581_v5, 0.5 }
 0x1c4   :  { %v614_v60 = vmul.f32 2.0, %v2560_v41  ;;  %vm598_vm12 = vcmp.lt.f32.partialorder %v582_v30, 0.5  ;;  %v615_v10 = vmul.f32 2.0, %v2563_v42  ;;  %vm599_vm14 = vcmp.lt.f32.partialorder %v583_v8, 0.5 }
 0x1c5   :  { %v629_v26 = vsel %vm597_vm10, %v613_v16, 0.0 }
 0x1c6   :  { %v630_v3 = vsel %vm598_vm12, %v614_v60, 0.0  ;;  %v631_v31 = vsel %vm599_vm14, %v615_v10, 0.0 }
 0x1cb   :  { %1619 = vmatmul.msk.f32.gmra.mxu1 %vm213_vm1, %v618_v52 }
 0x1d3   :  { %1620 = vmatmul.msk.f32.gmra.mxu1 %vm213_vm1, %v619_v58 }
 0x1db   :  { %1621 = vmatmul.msk.f32.gmra.mxu1 %vm213_vm1, %v620_v62 }
 0x1e3   :  { %1622 = vmatmul.msk.f32.gmra.mxu1 %vm213_vm1, %v621_v20 }
 0x1eb   :  { %1623 = vmatmul.msk.f32.gmra.mxu1 %vm213_vm1, %v622_v40 }
 0x1f3   :  { %1624 = vmatmul.msk.f32.gmra.mxu1 %vm213_vm1, %v623_v49 }
 0x1fb   :  { %1625 = vmatmul.msk.f32.gmra.mxu1 %vm213_vm1, %v624_v21 }
 0x203   :  { %1626 = vmatmul.msk.f32.gmra.mxu1 %vm213_vm1, %v625_v2 }
 0x20b   :  { %1627 = vmatmul.msk.f32.gmra.mxu1 %vm213_vm1, %v626_v14 }
 0x213   :  { %1628 = vmatmul.msk.f32.gmra.mxu1 %vm213_vm1, %v627_v4 }
 0x21b   :  { %1629 = vmatmul.msk.f32.gmra.mxu1 %vm213_vm1, %v628_v24 }
 0x223   :  { %1630 = vmatmul.msk.f32.gmra.mxu1 %vm213_vm1, %v629_v26 }
 0x22b   :  { %1631 = vmatmul.msk.f32.gmra.mxu1 %vm213_vm1, %v630_v3 }
 0x233   :  { %1632 = vmatmul.msk.f32.gmra.mxu1 %vm213_vm1, %v631_v31 }
 0x238   :  { %v705_v34 = vpop.f32.mrf.mxu1 }
 0x239   :  { %v706_v28 = vadd.f32 %v2649_v45, %v705_v34 }
 0x23b   :  { %v753_v53 = vmul.f32 0.5, %v706_v28 }
 0x240   :  { %v708_v15 = vpop.f32.mrf.mxu1 }
 0x241   :  { %v709_v42 = vadd.f32 %v2649_v45, %v708_v15 }
 0x243   :  { %v754_v52 = vmul.f32 0.5, %v709_v42 }
 0x245   :  { %1738 = vtanh.f32 %v754_v52 }
 0x246   :  { %1740 = vtanh.f32 %v753_v53 }
 0x248   :  { %v711_v27 = vpop.f32.mrf.mxu1 }
 0x249   :  { %v712_v46 = vadd.f32 %v2649_v45, %v711_v27 }
 0x24b   :  { %v755_v56 = vmul.f32 0.5, %v712_v46  ;;  %v1739_v38 = vpop.eup %1738 }
 0x24c   :  { %v1741_v17 = vpop.eup %1740  ;;  %v786_v33 = vmul.f32 0.5, %v1739_v38 }
 0x24d   :  { %1742 = vtanh.f32 %v755_v56  ;;  %v785_v40 = vmul.f32 0.5, %v1741_v17 }
 0x24e   :  { %v2662_v6 = vadd.f32 0.5, %v786_v33 }
 0x24f   :  { %v2665_v2 = vadd.f32 0.5, %v785_v40 }
 0x250   :  { %v714_v35 = vpop.f32.mrf.mxu1  ;;  %v858_v23 = vmul.f32 %v2662_v6, %v2662_v6  ;;  %v820_v31 = vsel %vm213_vm1, %v2662_v6, 0.0 }
 0x251   :  { %v715_v7 = vadd.f32 %v2649_v45, %v714_v35  ;;  %v857_v5 = vmul.f32 %v2665_v2, %v2665_v2  ;;  %v819_v35 = vsel %vm213_vm1, %v2665_v2, 0.0 }
 0x253   :  { %v756_v58 = vmul.f32 0.5, %v715_v7  ;;  %v1743_v47 = vpop.eup %1742  ;;  %v873_v28 = vsel %vm213_vm1, %v857_v5, 0.0 }
 0x254   :  { %v787_v54 = vmul.f32 0.5, %v1743_v47 }
 0x255   :  { %1744 = vtanh.f32 %v756_v58 }
 0x256   :  { %v2668_v4 = vadd.f32 0.5, %v787_v54 }
 0x258   :  { %v717_v51 = vpop.f32.mrf.mxu1  ;;  %v859_v34 = vmul.f32 %v2668_v4, %v2668_v4 }
 0x259   :  { %v718_v57 = vadd.f32 %v2649_v45, %v717_v51  ;;  %v874_v51 = vsel %vm213_vm1, %v858_v23, 0.0 }
 0x25a   :  { %v876_v52 = vsel %vm213_vm1, %v859_v34, 0.0  ;;  %v875_v58 = vadd.f32 %v874_v51, %v873_v28 }
 0x25b   :  { %v757_v61 = vmul.f32 0.5, %v718_v57  ;;  %v1745_v55 = vpop.eup %1744 }
 0x25c   :  { %v788_v11 = vmul.f32 0.5, %v1745_v55  ;;  %v877_v17 = vadd.f32 %v876_v52, %v875_v58 }
 0x25d   :  { %1746 = vtanh.f32 %v757_v61 }
 0x25e   :  { %v2674_v16 = vadd.f32 0.5, %v788_v11 }
 0x260   :  { %v720_v37 = vpop.f32.mrf.mxu1  ;;  %v824_v53 = vsel %vm213_vm1, %v2674_v16, 0.0 }
 0x261   :  { %v721_v59 = vadd.f32 %v2649_v45, %v720_v37 }
 0x263   :  { %v758_v62 = vmul.f32 0.5, %v721_v59  ;;  %v1747_v21 = vpop.eup %1746 }
 0x264   :  { %v789_v19 = vmul.f32 0.5, %v1747_v21 }
 0x265   :  { %1748 = vtanh.f32 %v758_v62 }
 0x266   :  { %v2681_v15 = vadd.f32 0.5, %v789_v19 }
 0x268   :  { %v723_v39 = vpop.f32.mrf.mxu1  ;;  %v861_v7 = vmul.f32 %v2681_v15, %v2681_v15  ;;  %v826_v61 = vsel %vm213_vm1, %v2681_v15, 0.0 }
 0x269   :  { %v724_v25 = vadd.f32 %v2649_v45, %v723_v39 }
 0x26a   :  { %v880_v33 = vsel %vm213_vm1, %v861_v7, 0.0 }
 0x26b   :  { %v759_v9 = vmul.f32 0.5, %v724_v25  ;;  %v1749_v13 = vpop.eup %1748 }
 0x26c   :  { %v790_v26 = vmul.f32 0.5, %v1749_v13 }
 0x26d   :  { %1750 = vtanh.f32 %v759_v9 }
 0x270   :  { %v726_v41 = vpop.f32.mrf.mxu1 }
 0x271   :  { %v727_v63 = vadd.f32 %v2649_v45, %v726_v41  ;;  %v822_v41 = vsel %vm213_vm1, %v2668_v4, 0.0 }
 0x273   :  { %v760_v36 = vmul.f32 0.5, %v727_v63  ;;  %v1751_v18 = vpop.eup %1750 }
 0x274   :  { %v791_v3 = vmul.f32 0.5, %v1751_v18 }
 0x275   :  { %1752 = vtanh.f32 %v760_v36 }
 0x276   :  { %v2693_v46 = vadd.f32 0.5, %v791_v3 }
 0x278   :  { %v729_v32 = vpop.f32.mrf.mxu1 }
 0x279   :  { %v730_v20 = vadd.f32 %v2649_v45, %v729_v32  ;;  %v860_v32 = vmul.f32 %v2674_v16, %v2674_v16 }
 0x27b   :  { %v761_v48 = vmul.f32 0.5, %v730_v20  ;;  %v1753_v60 = vpop.eup %1752 }
 0x27c   :  { %v792_v42 = vmul.f32 0.5, %v1753_v60 }
 0x27d   :  { %1754 = vtanh.f32 %v761_v48 }
 0x27e   :  { %v2705_v63 = vadd.f32 0.5, %v792_v42 }
 0x280   :  { %v732_v44 = vpop.f32.mrf.mxu1  ;;  %v864_v11 = vmul.f32 %v2705_v63, %v2705_v63  ;;  %v832_v23 = vsel %vm213_vm1, %v2705_v63, 0.0 }
 0x281   :  { %v733_v29 = vadd.f32 %v2649_v45, %v732_v44  ;;  %v2690_v44 = vadd.f32 0.5, %v790_v26 }
 0x283   :  { %v762_v0 = vmul.f32 0.5, %v733_v29  ;;  %v1755_v27 = vpop.eup %1754  ;;  %v862_v62 = vmul.f32 %v2690_v44, %v2690_v44  ;;  %v863_v29 = vmul.f32 %v2693_v46, %v2693_v46  ;;  %v828_v36 = vsel %vm213_vm1, %v2690_v44, 0.0 }
 0x284   :  { %v793_v56 = vmul.f32 0.5, %v1755_v27 }
 0x285   :  { %1756 = vtanh.f32 %v762_v0  ;;  %v882_v21 = vsel %vm213_vm1, %v862_v62, 0.0  ;;  %v884_v19 = vsel %vm213_vm1, %v863_v29, 0.0 }
 0x286   :  { %v2713_v40 = vadd.f32 0.5, %v793_v56 }
 0x288   :  { %v735_v22 = vpop.f32.mrf.mxu1 }
 0x289   :  { %v736_v49 = vadd.f32 %v2649_v45, %v735_v22  ;;  %v821_v22 = vadd.f32 %v820_v31, %v819_v35 }
 0x28b   :  { %v763_v14 = vmul.f32 0.5, %v736_v49  ;;  %v1757_v39 = vpop.eup %1756  ;;  %v823_v59 = vadd.f32 %v822_v41, %v821_v22 }
 0x28c   :  { %v794_v25 = vmul.f32 0.5, %v1757_v39 }
 0x28d   :  { %1758 = vtanh.f32 %v763_v14  ;;  %v825_v20 = vadd.f32 %v824_v53, %v823_v59 }
 0x28e   :  { %v2715_v54 = vadd.f32 0.5, %v794_v25 }
 0x28f   :  { %v827_v49 = vadd.f32 %v826_v61, %v825_v20 }
 0x290   :  { %v738_v50 = vpop.f32.mrf.mxu1  ;;  %v866_v3 = vmul.f32 %v2715_v54, %v2715_v54  ;;  %v836_v41 = vsel %vm213_vm1, %v2715_v54, 0.0 }
 0x291   :  { %v739_v1 = vadd.f32 %v2649_v45, %v738_v50  ;;  %v878_v50 = vsel %vm213_vm1, %v860_v32, 0.0  ;;  %v829_v18 = vadd.f32 %v828_v36, %v827_v49 }
 0x292   :  { %v879_v48 = vadd.f32 %v878_v50, %v877_v17  ;;  %v890_v53 = vsel %vm213_vm1, %v866_v3, 0.0 }
 0x293   :  { %v764_v24 = vmul.f32 0.5, %v739_v1  ;;  %v1759_v57 = vpop.eup %1758  ;;  %v830_v1 = vsel %vm213_vm1, %v2693_v46, 0.0 }
 0x294   :  { %v831_v60 = vadd.f32 %v830_v1, %v829_v18 }
 0x295   :  { %1760 = vtanh.f32 %v764_v24  ;;  %v865_v24 = vmul.f32 %v2713_v40, %v2713_v40 }
 0x296   :  { %v833_v51 = vadd.f32 %v832_v23, %v831_v60 }
 0x297   :  { %v888_v39 = vsel %vm213_vm1, %v865_v24, 0.0 }
 0x298   :  { %v741_v43 = vpop.f32.mrf.mxu1 }
 0x299   :  { %v742_v12 = vadd.f32 %v2649_v45, %v741_v43  ;;  %v795_v43 = vmul.f32 0.5, %v1759_v57 }
 0x29b   :  { %v765_v8 = vmul.f32 0.5, %v742_v12  ;;  %v1761_v9 = vpop.eup %1760  ;;  %v881_v12 = vadd.f32 %v880_v33, %v879_v48  ;;  %v2727_v5 = vadd.f32 0.5, %v795_v43 }
 0x29c   :  { %v796_v13 = vmul.f32 0.5, %v1761_v9 }
 0x29d   :  { %1762 = vtanh.f32 %v765_v8  ;;  %v886_v8 = vsel %vm213_vm1, %v864_v11, 0.0  ;;  %v867_v32 = vmul.f32 %v2727_v5, %v2727_v5  ;;  %v838_v56 = vsel %vm213_vm1, %v2727_v5, 0.0 }
 0x29e   :  { %v2734_v31 = vadd.f32 0.5, %v796_v13 }
 0x29f   :  { %v892_v50 = vsel %vm213_vm1, %v867_v32, 0.0 }
 0x2a0   :  { %v744_v30 = vpop.f32.mrf.mxu1  ;;  %v840_v61 = vsel %vm213_vm1, %v2734_v31, 0.0 }
 0x2a1   :  { %v745_v10 = vadd.f32 %v2649_v45, %v744_v30  ;;  %v883_v30 = vadd.f32 %v882_v21, %v881_v12 }
 0x2a3   :  { %v766_v37 = vmul.f32 0.5, %v745_v10  ;;  %v1763_v55 = vpop.eup %1762  ;;  %v834_v10 = vsel %vm213_vm1, %v2713_v40, 0.0  ;;  %v885_v35 = vadd.f32 %v884_v19, %v883_v30 }
 0x2a4   :  { %v797_v26 = vmul.f32 0.5, %v1763_v55  ;;  %v835_v52 = vadd.f32 %v834_v10, %v833_v51 }
 0x2a5   :  { %1764 = vtanh.f32 %v766_v37  ;;  %v887_v22 = vadd.f32 %v886_v8, %v885_v35 }
 0x2a6   :  { %v2742_v42 = vadd.f32 0.5, %v797_v26  ;;  %v837_v25 = vadd.f32 %v836_v41, %v835_v52 }
 0x2a7   :  { %v889_v59 = vadd.f32 %v888_v39, %v887_v22 }
 0x2a8   :  { %v747_v38 = vpop.f32.mrf.mxu1  ;;  %v869_v62 = vmul.f32 %v2742_v42, %v2742_v42  ;;  %v839_v17 = vadd.f32 %v838_v56, %v837_v25  ;;  %v842_v29 = vsel %vm213_vm1, %v2742_v42, 0.0  ;;  %v1033_v56 = vld [vmem:[%s3309_s10 + $0x18] sm:$0xff]  ;;  %v1031_v25 = vld [vmem:[%s3309_s10 + $0x8] sm:$0xff] }
 0x2a9   :  { %v748_v47 = vadd.f32 %v2649_v45, %v747_v38  ;;  %v891_v9 = vadd.f32 %v890_v53, %v889_v59  ;;  %1098 = vmatpush.msra.mxu2 %v1033_v56 }
 0x2aa   :  { %v841_v36 = vadd.f32 %v840_v61, %v839_v17  ;;  %v896_v43 = vsel %vm213_vm1, %v869_v62, 0.0  ;;  %v1030_v61 = vld [vmem:[%s3309_s10] sm:$0xff] }
 0x2ab   :  { %v767_v0 = vmul.f32 0.5, %v748_v47  ;;  %v1765_v14 = vpop.eup %1764  ;;  %v893_v33 = vadd.f32 %v892_v50, %v891_v9 }
 0x2ac   :  { %v798_v34 = vmul.f32 0.5, %v1765_v14  ;;  %v843_v21 = vadd.f32 %v842_v29, %v841_v36 }
 0x2ad   :  { %1766 = vtanh.f32 %v767_v0 }
 0x2ae   :  { %v2749_v57 = vadd.f32 0.5, %v798_v34 }
 0x2b0   :  { %v750_v27 = vpop.f32.mrf.mxu1  ;;  %v870_v47 = vmul.f32 %v2749_v57, %v2749_v57  ;;  %v844_v55 = vsel %vm213_vm1, %v2749_v57, 0.0 }
 0x2b1   :  { %v751_v37 = vadd.f32 %v2649_v45, %v750_v27  ;;  %v868_v45 = vmul.f32 %v2734_v31, %v2734_v31  ;;  %v845_v12 = vadd.f32 %v844_v55, %v843_v21 }
 0x2b2   :  { %v898_v1 = vsel %vm213_vm1, %v870_v47, 0.0 }
 0x2b3   :  { %v1767_v28 = vpop.eup %1766  ;;  %v768_v7 = vmul.f32 0.5, %v751_v37  ;;  %v894_v20 = vsel %vm213_vm1, %v868_v45, 0.0  ;;  %v1032_v45 = vld [vmem:[%s3309_s10 + $0x10] sm:$0xff] }
 0x2b4   :  { %v799_v58 = vmul.f32 0.5, %v1767_v28  ;;  %v895_v0 = vadd.f32 %v894_v20, %v893_v33  ;;  %1099 = vmatpush.msra.mxu2 %v1032_v45  ;;  %v817_v33 = vld [vmem:[%s3310_s8] sm:$0x1] }
 0x2b5   :  { %1768 = vtanh.f32 %v768_v7 }
 0x2b6   :  { %v2756_v38 = vadd.f32 0.5, %v799_v58  ;;  %v897_v14 = vadd.f32 %v896_v43, %v895_v0  ;;  %1100 = vmatpush.msra.mxu2 %v1031_v25 }
 0x2b8   :  { %v871_v48 = vmul.f32 %v2756_v38, %v2756_v38  ;;  %v846_v11 = vsel %vm213_vm1, %v2756_v38, 0.0  ;;  %v899_v23 = vadd.f32 %v898_v1, %v897_v14  ;;  %1101 = vmatpush.msra.mxu2 %v1030_v61 }
 0x2b9   :  { %v847_v24 = vadd.f32 %v846_v11, %v845_v12 }
 0x2ba   :  { %v900_v18 = vsel %vm213_vm1, %v871_v48, 0.0  ;;  %v818_v48 = vld [vmem:[%s3311_s9] sm:$0x1] }
 0x2bb   :  { %v1769_v49 = vpop.eup %1768  ;;  %v901_v60 = vadd.f32 %v900_v18, %v899_v23 }
 0x2bc   :  { %v800_v13 = vmul.f32 0.5, %v1769_v49 }
 0x2be   :  { %v2772_v19 = vadd.f32 0.5, %v800_v13  ;;  %v1633_v13 = vld [vmem:[%s3307_s1 + $0x80] sm:$0xff] }
 0x2bf   :  { %vm982_vm11 = vcmp.lt.f32.partialorder %v1633_v13, 0.5  ;;  %v1644_v13 = vld [vmem:[%s3307_s1 + $0xd8] sm:$0xff] }
 0x2c0   :  { %v848_v26 = vsel %vm213_vm1, %v2772_v19, 0.0  ;;  %v872_v30 = vmul.f32 %v2772_v19, %v2772_v19  ;;  %vm993_vm14 = vcmp.lt.f32.partialorder %v1644_v13, 0.5 }
 0x2c1   :  { %v849_v3 = vadd.f32 %v848_v26, %v847_v24 }
 0x2c2   :  { %v902_v8 = vsel %vm213_vm1, %v872_v30, 0.0 }
 0x2c3   :  { %v850_v10 = vrot.slane %v849_v3, 4  ;;  %v903_v34 = vadd.f32 %v902_v8, %v901_v60 }
 0x2c5   :  { %v851_v27 = vadd.f32 %v850_v10, %v849_v3  ;;  %v904_v35 = vrot.slane %v903_v34, 4 }
 0x2c7   :  { %v852_v51 = vrot.slane %v851_v27, 2  ;;  %v905_v37 = vadd.f32 %v904_v35, %v903_v34 }
 0x2c9   :  { %v853_v39 = vadd.f32 %v852_v51, %v851_v27  ;;  %v906_v41 = vrot.slane %v905_v37, 2 }
 0x2cb   :  { %v854_v32 = vrot.slane %v853_v39, 1  ;;  %v907_v28 = vadd.f32 %v906_v41, %v905_v37 }
 0x2cd   :  { %v855_v22 = vadd.f32 %v854_v32, %v853_v39  ;;  %v908_v52 = vrot.slane %v907_v28, 1 }
 0x2cf   :  { %v856_v53 = vmul.f32 0.0078125, %v855_v22  ;;  %v909_v7 = vadd.f32 %v908_v52, %v907_v28 }
 0x2d1   :  { %v910_v58 = vmul.f32 0.0078125, %v909_v7  ;;  %v911_v59 = vmul.f32 %v856_v53, %v856_v53 }
 0x2d3   :  { %v912_v50 = vsub.f32 %v910_v58, %v911_v59 }
 0x2d5   :  { %v913_v62 = vadd.f32 1e-05, %v912_v50 }
 0x2d7   :  { %1770 = vrsqrt.f32 %v913_v62  ;;  %vm920_vm2 = vweird.f32 %v913_v62 }
 0x2dd   :  { %v1771_v9 = vpop.eup %1770 }
 0x2de   :  { %v915_v17 = vmul.f32 %v1771_v9, %v913_v62  ;;  %vm921_vm0 = vweird.f32 %v1771_v9 }
 0x2df   :  { %vm922_vm7 = vmor %vm920_vm2, %vm921_vm0 }
 0x2e0   :  { %v916_v20 = vmul.f32 %v1771_v9, %v915_v17 }
 0x2e2   :  { %v917_v29 = vmul.f32 0.5, %v916_v20 }
 0x2e4   :  { %v918_v47 = vsub.f32 1.5, %v917_v29 }
 0x2e6   :  { %v919_v36 = vmul.f32 %v1771_v9, %v918_v47 }
 0x2e8   :  { %v923_v43 = vsel %vm922_vm7, %v1771_v9, %v919_v36 }
 0x2e9   :  { %v924_v55 = vmul.f32 %v923_v43, %v817_v33  ;;  %v1641_v43 = vld [vmem:[%s3307_s1 + $0xc0] sm:$0xff] }
 0x2ea   :  { %vm990_vm8 = vcmp.lt.f32.partialorder %v1641_v43, 0.5 }
 0x2eb   :  { %v925_v49 = vmul.f32 %v924_v55, %v856_v53  ;;  %v2797_v0 = vperm.slane %v924_v55, 0 }
 0x2ed   :  { %v926_v21 = vsub.f32 %v818_v48, %v925_v49  ;;  %v930_v11 = vmul.f32 %v2797_v0, %v2665_v2  ;;  %v943_v14 = vmul.f32 %v2797_v0, %v2749_v57  ;;  %v931_v23 = vmul.f32 %v2797_v0, %v2662_v6  ;;  %v1642_v48 = vld [vmem:[%s3307_s1 + $0xc8] sm:$0xff] }
 0x2ee   :  { %v938_v24 = vmul.f32 %v2797_v0, %v2713_v40  ;;  %v939_v2 = vmul.f32 %v2797_v0, %v2715_v54  ;;  %v940_v60 = vmul.f32 %v2797_v0, %v2727_v5  ;;  %v941_v57 = vmul.f32 %v2797_v0, %v2734_v31  ;;  %v1634_v40 = vld [vmem:[%s3307_s1 + $0x88] sm:$0xff] }
 0x2ef   :  { %v2799_v1 = vperm.slane %v926_v21, 0  ;;  %v942_v6 = vmul.f32 %v2797_v0, %v2742_v42  ;;  %v944_v42 = vmul.f32 %v2797_v0, %v2756_v38  ;;  %v945_v34 = vmul.f32 %v2797_v0, %v2772_v19  ;;  %v1635_v38 = vld [vmem:[%s3307_s1 + $0x90] sm:$0xff] }
 0x2f0   :  { %vm983_vm15 = vcmp.lt.f32.partialorder %v1634_v40, 0.5  ;;  %v932_v37 = vmul.f32 %v2797_v0, %v2668_v4  ;;  %vm984_vm5 = vcmp.lt.f32.partialorder %v1635_v38, 0.5  ;;  %v933_v32 = vmul.f32 %v2797_v0, %v2674_v16  ;;  %v1636_v4 = vld [vmem:[%s3307_s1 + $0x98] sm:$0xff]  ;;  %v1637_v16 = vld [vmem:[%s3307_s1 + $0xa0] sm:$0xff]  ;;  %v1643_v21 = vld [vmem:[%s3307_s1 + $0xd0] sm:$0xff] }
 0x2f1   :  { %v949_v12 = vadd.f32 %v2799_v1, %v930_v11  ;;  %v950_v30 = vadd.f32 %v2799_v1, %v931_v23  ;;  %v957_v54 = vadd.f32 %v2799_v1, %v938_v24  ;;  %v958_v3 = vadd.f32 %v2799_v1, %v939_v2  ;;  %v1646_v2 = vld [vmem:[%s3307_s1 + $0xe8] sm:$0xff]  ;;  %v1648_v40 = vld [vmem:[%s3307_s1 + $0xf8] sm:$0xff] }
 0x2f2   :  { %v2829_v8 = vadd.f32 %v2799_v1, %v940_v60  ;;  %v2832_v5 = vadd.f32 %v2799_v1, %v941_v57  ;;  %v2835_v31 = vadd.f32 %v2799_v1, %v942_v6  ;;  %v2838_v10 = vadd.f32 %v2799_v1, %v943_v14  ;;  %v1647_v60 = vld [vmem:[%s3307_s1 + $0xf0] sm:$0xff] }
 0x2f3   :  { %v998_v18 = vmul.f32 2.0, %v949_v12  ;;  %v999_v27 = vmul.f32 2.0, %v950_v30  ;;  %v2845_v35 = vadd.f32 %v2799_v1, %v944_v42  ;;  %v2848_v51 = vadd.f32 %v2799_v1, %v945_v34 }
 0x2f4   :  { %v951_v41 = vadd.f32 %v2799_v1, %v932_v37  ;;  %v952_v22 = vadd.f32 %v2799_v1, %v933_v32  ;;  %vm985_vm9 = vcmp.lt.f32.partialorder %v1636_v4, 0.5  ;;  %v934_v53 = vmul.f32 %v2797_v0, %v2681_v15  ;;  %v1638_v15 = vld [vmem:[%s3307_s1 + $0xa8] sm:$0xff] }
 0x2f5   :  { %v1014_v26 = vsel %vm982_vm11, %v998_v18, 0.0  ;;  %v1015_v39 = vsel %vm983_vm15, %v999_v27, 0.0  ;;  %vm986_vm13 = vcmp.lt.f32.partialorder %v1637_v16, 0.5  ;;  %v935_v58 = vmul.f32 %v2797_v0, %v2690_v44  ;;  %v1639_v44 = vld [vmem:[%s3307_s1 + $0xb0] sm:$0xff]  ;;  %v1645_v18 = vld [vmem:[%s3307_s1 + $0xe0] sm:$0xff] }
 0x2f6   :  { %1649 = vmatmul.msk.f32.vlgmr.msra.gmra.mxu2 %vm213_vm1, %v1014_v26  ;;  %v1000_v19 = vmul.f32 2.0, %v951_v41  ;;  %v1001_v52 = vmul.f32 2.0, %v952_v22  ;;  %v953_v56 = vadd.f32 %v2799_v1, %v934_v53  ;;  %vm987_vm3 = vcmp.lt.f32.partialorder %v1638_v15, 0.5  ;;  %v2934_v41 = vld [vmem:[%s3312_s11] ss:$0 sm:$0xff] }
 0x2f7   :  { %v954_v25 = vadd.f32 %v2799_v1, %v935_v58  ;;  %v936_v61 = vmul.f32 %v2797_v0, %v2693_v46  ;;  %vm988_vm4 = vcmp.lt.f32.partialorder %v1639_v44, 0.5  ;;  %v937_v20 = vmul.f32 %v2797_v0, %v2705_v63  ;;  %v1640_v46 = vld [vmem:[%s3307_s1 + $0xb8] sm:$0xff] }
 0x2f8   :  { %v1016_v28 = vsel %vm984_vm5, %v1000_v19, 0.0  ;;  %v1017_v7 = vsel %vm985_vm9, %v1001_v52, 0.0  ;;  %v1002_v45 = vmul.f32 2.0, %v953_v56  ;;  %vm989_vm6 = vcmp.lt.f32.partialorder %v1640_v46, 0.5 }
 0x2f9   :  { %v1003_v50 = vmul.f32 2.0, %v954_v25  ;;  %v955_v9 = vadd.f32 %v2799_v1, %v936_v61  ;;  %v956_v47 = vadd.f32 %v2799_v1, %v937_v20  ;;  %v1006_v55 = vmul.f32 2.0, %v957_v54 }
 0x2fa   :  { %v1018_v59 = vsel %vm986_vm13, %v1002_v45, 0.0  ;;  %v1007_v49 = vmul.f32 2.0, %v958_v3  ;;  %vm991_vm10 = vcmp.lt.f32.partialorder %v1642_v48, 0.5  ;;  %v1008_v1 = vmul.f32 2.0, %v2829_v8 }
 0x2fb   :  { %v1019_v62 = vsel %vm987_vm3, %v1003_v50, 0.0  ;;  %v1004_v17 = vmul.f32 2.0, %v955_v9  ;;  %v1005_v33 = vmul.f32 2.0, %v956_v47  ;;  %v1022_v63 = vsel %vm990_vm8, %v1006_v55, 0.0 }
 0x2fc   :  { %v1023_v0 = vsel %vm991_vm10, %v1007_v49, 0.0  ;;  %vm992_vm12 = vcmp.lt.f32.partialorder %v1643_v21, 0.5  ;;  %v1009_v14 = vmul.f32 2.0, %v2832_v5  ;;  %v1010_v23 = vmul.f32 2.0, %v2835_v31 }
 0x2fd   :  { %v1020_v29 = vsel %vm988_vm4, %v1004_v17, 0.0  ;;  %v1021_v36 = vsel %vm989_vm6, %v1005_v33, 0.0  ;;  %v1024_v11 = vsel %vm992_vm12, %v1008_v1, 0.0  ;;  %vm994_vm0 = vcmp.lt.f32.partialorder %v1645_v18, 0.5 }
 0x2fe   :  { %1650 = vmatmul.msk.f32.gmra.mxu2 %vm213_vm1, %v1015_v39  ;;  %v1025_v12 = vsel %vm993_vm14, %v1009_v14, 0.0  ;;  %v1026_v24 = vsel %vm994_vm0, %v1010_v23, 0.0  ;;  %v1011_v26 = vmul.f32 2.0, %v2838_v10  ;;  %vm995_vm2 = vcmp.lt.f32.partialorder %v1646_v2, 0.5 }
 0x2ff   :  { %v1012_v57 = vmul.f32 2.0, %v2845_v35  ;;  %vm996_vm7 = vcmp.lt.f32.partialorder %v1647_v60, 0.5  ;;  %v1013_v54 = vmul.f32 2.0, %v2848_v51  ;;  %vm997_vm11 = vcmp.lt.f32.partialorder %v1648_v40, 0.5 }
 0x300   :  { %v1027_v30 = vsel %vm995_vm2, %v1011_v26, 0.0 }
 0x301   :  { %v1028_v6 = vsel %vm996_vm7, %v1012_v57, 0.0  ;;  %v1029_v3 = vsel %vm997_vm11, %v1013_v54, 0.0 }
 0x306   :  { %1651 = vmatmul.msk.f32.gmra.mxu2 %vm213_vm1, %v1016_v28 }
 0x30e   :  { %1652 = vmatmul.msk.f32.gmra.mxu2 %vm213_vm1, %v1017_v7 }
 0x316   :  { %1653 = vmatmul.msk.f32.gmra.mxu2 %vm213_vm1, %v1018_v59 }
 0x31e   :  { %1654 = vmatmul.msk.f32.gmra.mxu2 %vm213_vm1, %v1019_v62 }
 0x326   :  { %1655 = vmatmul.msk.f32.gmra.mxu2 %vm213_vm1, %v1020_v29 }
 0x32e   :  { %1656 = vmatmul.msk.f32.gmra.mxu2 %vm213_vm1, %v1021_v36 }
 0x336   :  { %1657 = vmatmul.msk.f32.gmra.mxu2 %vm213_vm1, %v1022_v63 }
 0x33e   :  { %1658 = vmatmul.msk.f32.gmra.mxu2 %vm213_vm1, %v1023_v0 }
 0x346   :  { %1659 = vmatmul.msk.f32.gmra.mxu2 %vm213_vm1, %v1024_v11 }
 0x34e   :  { %1660 = vmatmul.msk.f32.gmra.mxu2 %vm213_vm1, %v1025_v12 }
 0x356   :  { %1661 = vmatmul.msk.f32.gmra.mxu2 %vm213_vm1, %v1026_v24 }
 0x35e   :  { %1662 = vmatmul.msk.f32.gmra.mxu2 %vm213_vm1, %v1027_v30 }
 0x366   :  { %1663 = vmatmul.msk.f32.gmra.mxu2 %vm213_vm1, %v1028_v6 }
 0x36e   :  { %1664 = vmatmul.msk.f32.gmra.mxu2 %vm213_vm1, %v1029_v3 }
 0x379   :  { %v1103_v8 = vpop.f32.mrf.mxu2 }
 0x37a   :  { %v1104_v38 = vadd.f32 %v2934_v41, %v1103_v8 }
 0x37c   :  { %v1151_v22 = vmul.f32 0.5, %v1104_v38 }
 0x381   :  { %v1106_v5 = vpop.f32.mrf.mxu2 }
 0x382   :  { %v1107_v51 = vadd.f32 %v2934_v41, %v1106_v5 }
 0x384   :  { %v1152_v28 = vmul.f32 0.5, %v1107_v51 }
 0x386   :  { %1772 = vtanh.f32 %v1152_v28 }
 0x387   :  { %1774 = vtanh.f32 %v1151_v22 }
 0x389   :  { %v1109_v31 = vpop.f32.mrf.mxu2 }
 0x38a   :  { %v1110_v32 = vadd.f32 %v2934_v41, %v1109_v31 }
 0x38c   :  { %v1153_v52 = vmul.f32 0.5, %v1110_v32  ;;  %v1773_v15 = vpop.eup %1772 }
 0x38d   :  { %v1775_v61 = vpop.eup %1774  ;;  %v1184_v17 = vmul.f32 0.5, %v1773_v15 }
 0x38e   :  { %1776 = vtanh.f32 %v1153_v52  ;;  %v1183_v29 = vmul.f32 0.5, %v1775_v61 }
 0x38f   :  { %v2947_v48 = vadd.f32 0.5, %v1184_v17 }
 0x390   :  { %v2950_v0 = vadd.f32 0.5, %v1183_v29 }
 0x391   :  { %v1112_v10 = vpop.f32.mrf.mxu2  ;;  %v1256_v23 = vmul.f32 %v2947_v48, %v2947_v48  ;;  %v1218_v3 = vsel %vm213_vm1, %v2947_v48, 0.0 }
 0x392   :  { %v1113_v4 = vadd.f32 %v2934_v41, %v1112_v10  ;;  %v1255_v2 = vmul.f32 %v2950_v0, %v2950_v0  ;;  %v1217_v10 = vsel %vm213_vm1, %v2950_v0, 0.0 }
 0x394   :  { %v1154_v7 = vmul.f32 0.5, %v1113_v4  ;;  %v1777_v44 = vpop.eup %1776  ;;  %v1271_v38 = vsel %vm213_vm1, %v1255_v2, 0.0 }
 0x395   :  { %v1185_v43 = vmul.f32 0.5, %v1777_v44 }
 0x396   :  { %1778 = vtanh.f32 %v1154_v7 }
 0x397   :  { %v2953_v12 = vadd.f32 0.5, %v1185_v43 }
 0x399   :  { %v1115_v42 = vpop.f32.mrf.mxu2  ;;  %v1257_v8 = vmul.f32 %v2953_v12, %v2953_v12 }
 0x39a   :  { %v1116_v53 = vadd.f32 %v2934_v41, %v1115_v42  ;;  %v1272_v42 = vsel %vm213_vm1, %v1256_v23, 0.0 }
 0x39b   :  { %v1274_v28 = vsel %vm213_vm1, %v1257_v8, 0.0  ;;  %v1273_v7 = vadd.f32 %v1272_v42, %v1271_v38 }
 0x39c   :  { %v1155_v58 = vmul.f32 0.5, %v1116_v53  ;;  %v1779_v46 = vpop.eup %1778 }
 0x39d   :  { %v1186_v21 = vmul.f32 0.5, %v1779_v46  ;;  %v1275_v61 = vadd.f32 %v1274_v28, %v1273_v7 }
 0x39e   :  { %1780 = vtanh.f32 %v1155_v58 }
 0x39f   :  { %v2959_v26 = vadd.f32 0.5, %v1186_v21 }
 0x3a1   :  { %v1118_v34 = vpop.f32.mrf.mxu2  ;;  %v1222_v22 = vsel %vm213_vm1, %v2959_v26, 0.0 }
 0x3a2   :  { %v1119_v56 = vadd.f32 %v2934_v41, %v1118_v34 }
 0x3a4   :  { %v1156_v59 = vmul.f32 0.5, %v1119_v56  ;;  %v1781_v63 = vpop.eup %1780 }
 0x3a5   :  { %v1187_v18 = vmul.f32 0.5, %v1781_v63 }
 0x3a6   :  { %1782 = vtanh.f32 %v1156_v59 }
 0x3a7   :  { %v2966_v5 = vadd.f32 0.5, %v1187_v18 }
 0x3a9   :  { %v1121_v27 = vpop.f32.mrf.mxu2  ;;  %v1259_v4 = vmul.f32 %v2966_v5, %v2966_v5  ;;  %v1224_v58 = vsel %vm213_vm1, %v2966_v5, 0.0 }
 0x3aa   :  { %v1122_v16 = vadd.f32 %v2934_v41, %v1121_v27 }
 0x3ab   :  { %v1278_v17 = vsel %vm213_vm1, %v1259_v4, 0.0 }
 0x3ac   :  { %v1157_v50 = vmul.f32 0.5, %v1122_v16  ;;  %v1783_v1 = vpop.eup %1782 }
 0x3ad   :  { %v1188_v30 = vmul.f32 0.5, %v1783_v1 }
 0x3ae   :  { %1784 = vtanh.f32 %v1157_v50 }
 0x3b1   :  { %v1124_v35 = vpop.f32.mrf.mxu2 }
 0x3b2   :  { %v1125_v25 = vadd.f32 %v2934_v41, %v1124_v35  ;;  %v1220_v35 = vsel %vm213_vm1, %v2953_v12, 0.0 }
 0x3b4   :  { %v1158_v20 = vmul.f32 0.5, %v1125_v25  ;;  %v1785_v14 = vpop.eup %1784 }
 0x3b5   :  { %v1189_v6 = vmul.f32 0.5, %v1785_v14 }
 0x3b6   :  { %1786 = vtanh.f32 %v1158_v20 }
 0x3b7   :  { %v2978_v32 = vadd.f32 0.5, %v1189_v6 }
 0x3b9   :  { %v1127_v37 = vpop.f32.mrf.mxu2 }
 0x3ba   :  { %v1128_v62 = vadd.f32 %v2934_v41, %v1127_v37  ;;  %v1258_v37 = vmul.f32 %v2959_v26, %v2959_v26 }
 0x3bc   :  { %v1159_v33 = vmul.f32 0.5, %v1128_v62  ;;  %v1787_v57 = vpop.eup %1786 }
 0x3bd   :  { %v1190_v51 = vmul.f32 0.5, %v1787_v57 }
 0x3be   :  { %1788 = vtanh.f32 %v1159_v33 }
 0x3bf   :  { %v2990_v25 = vadd.f32 0.5, %v1190_v51 }
 0x3c1   :  { %v1130_v39 = vpop.f32.mrf.mxu2  ;;  %v1262_v21 = vmul.f32 %v2990_v25, %v2990_v25  ;;  %v1230_v23 = vsel %vm213_vm1, %v2990_v25, 0.0 }
 0x3c2   :  { %v1131_v9 = vadd.f32 %v2934_v41, %v1130_v39  ;;  %v2975_v39 = vadd.f32 0.5, %v1188_v30 }
 0x3c4   :  { %v1160_v55 = vmul.f32 0.5, %v1131_v9  ;;  %v1789_v31 = vpop.eup %1788  ;;  %v1260_v59 = vmul.f32 %v2975_v39, %v2975_v39  ;;  %v1261_v9 = vmul.f32 %v2978_v32, %v2978_v32  ;;  %v1226_v20 = vsel %vm213_vm1, %v2975_v39, 0.0 }
 0x3c5   :  { %v1191_v52 = vmul.f32 0.5, %v1789_v31 }
 0x3c6   :  { %1790 = vtanh.f32 %v1160_v55  ;;  %v1280_v63 = vsel %vm213_vm1, %v1260_v59, 0.0  ;;  %v1282_v18 = vsel %vm213_vm1, %v1261_v9, 0.0 }
 0x3c7   :  { %v2998_v29 = vadd.f32 0.5, %v1191_v52 }
 0x3c9   :  { %v1133_v19 = vpop.f32.mrf.mxu2 }
 0x3ca   :  { %v1134_v36 = vadd.f32 %v2934_v41, %v1133_v19  ;;  %v1219_v19 = vadd.f32 %v1218_v3, %v1217_v10 }
 0x3cc   :  { %v1161_v11 = vmul.f32 0.5, %v1134_v36  ;;  %v1791_v27 = vpop.eup %1790  ;;  %v1221_v56 = vadd.f32 %v1220_v35, %v1219_v19 }
 0x3cd   :  { %v1192_v16 = vmul.f32 0.5, %v1791_v27 }
 0x3ce   :  { %1792 = vtanh.f32 %v1161_v11  ;;  %v1223_v62 = vadd.f32 %v1222_v22, %v1221_v56 }
 0x3cf   :  { %v3000_v43 = vadd.f32 0.5, %v1192_v16 }
 0x3d0   :  { %v1225_v36 = vadd.f32 %v1224_v58, %v1223_v62 }
 0x3d1   :  { %v1136_v45 = vpop.f32.mrf.mxu2  ;;  %v1264_v6 = vmul.f32 %v3000_v43, %v3000_v43  ;;  %v1234_v35 = vsel %vm213_vm1, %v3000_v43, 0.0 }
 0x3d2   :  { %v1137_v49 = vadd.f32 %v2934_v41, %v1136_v45  ;;  %v1276_v45 = vsel %vm213_vm1, %v1258_v37, 0.0  ;;  %v1227_v14 = vadd.f32 %v1226_v20, %v1225_v36 }
 0x3d3   :  { %v1277_v33 = vadd.f32 %v1276_v45, %v1275_v61  ;;  %v1288_v22 = vsel %vm213_vm1, %v1264_v6, 0.0 }
 0x3d4   :  { %v1162_v24 = vmul.f32 0.5, %v1137_v49  ;;  %v1793_v53 = vpop.eup %1792  ;;  %v1228_v49 = vsel %vm213_vm1, %v2978_v32, 0.0 }
 0x3d5   :  { %v1229_v57 = vadd.f32 %v1228_v49, %v1227_v14 }
 0x3d6   :  { %1794 = vtanh.f32 %v1162_v24  ;;  %v1263_v24 = vmul.f32 %v2998_v29, %v2998_v29 }
 0x3d7   :  { %v1231_v42 = vadd.f32 %v1230_v23, %v1229_v57 }
 0x3d8   :  { %v1286_v27 = vsel %vm213_vm1, %v1263_v24, 0.0 }
 0x3d9   :  { %v1139_v47 = vpop.f32.mrf.mxu2 }
 0x3da   :  { %v1140_v13 = vadd.f32 %v2934_v41, %v1139_v47  ;;  %v1193_v47 = vmul.f32 0.5, %v1793_v53 }
 0x3dc   :  { %v1163_v40 = vmul.f32 0.5, %v1140_v13  ;;  %v1795_v50 = vpop.eup %1794  ;;  %v1279_v13 = vadd.f32 %v1278_v17, %v1277_v33  ;;  %v3012_v2 = vadd.f32 0.5, %v1193_v47 }
 0x3dd   :  { %v1194_v1 = vmul.f32 0.5, %v1795_v50 }
 0x3de   :  { %1796 = vtanh.f32 %v1163_v40  ;;  %v1284_v40 = vsel %vm213_vm1, %v1262_v21, 0.0  ;;  %v1265_v37 = vmul.f32 %v3012_v2, %v3012_v2  ;;  %v1236_v52 = vsel %vm213_vm1, %v3012_v2, 0.0 }
 0x3df   :  { %v3019_v3 = vadd.f32 0.5, %v1194_v1 }
 0x3e0   :  { %v1290_v45 = vsel %vm213_vm1, %v1265_v37, 0.0 }
 0x3e1   :  { %v1142_v60 = vpop.f32.mrf.mxu2  ;;  %v1238_v58 = vsel %vm213_vm1, %v3019_v3, 0.0 }
 0x3e2   :  { %v1143_v54 = vadd.f32 %v2934_v41, %v1142_v60  ;;  %v1281_v60 = vadd.f32 %v1280_v63, %v1279_v13 }
 0x3e4   :  { %v1164_v34 = vmul.f32 0.5, %v1143_v54  ;;  %v1797_v46 = vpop.eup %1796  ;;  %v1232_v54 = vsel %vm213_vm1, %v2998_v29, 0.0  ;;  %v1283_v10 = vadd.f32 %v1282_v18, %v1281_v60 }
 0x3e5   :  { %v1195_v30 = vmul.f32 0.5, %v1797_v46  ;;  %v1233_v28 = vadd.f32 %v1232_v54, %v1231_v42 }
 0x3e6   :  { %1798 = vtanh.f32 %v1164_v34  ;;  %v1285_v19 = vadd.f32 %v1284_v40, %v1283_v10 }
 0x3e7   :  { %v3027_v51 = vadd.f32 0.5, %v1195_v30  ;;  %v1235_v16 = vadd.f32 %v1234_v35, %v1233_v28 }
 0x3e8   :  { %v1287_v56 = vadd.f32 %v1286_v27, %v1285_v19 }
 0x3e9   :  { %v1145_v15 = vpop.f32.mrf.mxu2  ;;  %v1267_v59 = vmul.f32 %v3027_v51, %v3027_v51  ;;  %v1237_v61 = vadd.f32 %v1236_v52, %v1235_v16  ;;  %v1240_v9 = vsel %vm213_vm1, %v3027_v51, 0.0  ;;  %v1431_v52 = vld [vmem:[%s3313_s14 + $0x18] sm:$0xff]  ;;  %v1429_v16 = vld [vmem:[%s3313_s14 + $0x8] sm:$0xff] }
 0x3ea   :  { %v1146_v44 = vadd.f32 %v2934_v41, %v1145_v15  ;;  %v1289_v50 = vadd.f32 %v1288_v22, %v1287_v56  ;;  %1496 = vmatpush.msra.mxu3 %v1431_v52 }
 0x3eb   :  { %v1239_v20 = vadd.f32 %v1238_v58, %v1237_v61  ;;  %v1294_v47 = vsel %vm213_vm1, %v1267_v59, 0.0  ;;  %v1428_v58 = vld [vmem:[%s3313_s14] sm:$0xff] }
 0x3ec   :  { %v1165_v55 = vmul.f32 0.5, %v1146_v44  ;;  %v1799_v11 = vpop.eup %1798  ;;  %v1291_v17 = vadd.f32 %v1290_v45, %v1289_v50 }
 0x3ed   :  { %v1196_v8 = vmul.f32 0.5, %v1799_v11  ;;  %v1241_v63 = vadd.f32 %v1240_v9, %v1239_v20 }
 0x3ee   :  { %1800 = vtanh.f32 %v1165_v55 }
 0x3ef   :  { %v3034_v53 = vadd.f32 0.5, %v1196_v8 }
 0x3f1   :  { %v1148_v31 = vpop.f32.mrf.mxu2  ;;  %v1268_v44 = vmul.f32 %v3034_v53, %v3034_v53  ;;  %v1242_v46 = vsel %vm213_vm1, %v3034_v53, 0.0 }
 0x3f2   :  { %v1149_v34 = vadd.f32 %v2934_v41, %v1148_v31  ;;  %v1266_v41 = vmul.f32 %v3019_v3, %v3019_v3  ;;  %v1243_v13 = vadd.f32 %v1242_v46, %v1241_v63 }
 0x3f3   :  { %v1296_v49 = vsel %vm213_vm1, %v1268_v44, 0.0 }
 0x3f4   :  { %v1801_v38 = vpop.eup %1800  ;;  %v1166_v4 = vmul.f32 0.5, %v1149_v34  ;;  %v1292_v62 = vsel %vm213_vm1, %v1266_v41, 0.0  ;;  %v1430_v41 = vld [vmem:[%s3313_s14 + $0x10] sm:$0xff] }
 0x3f5   :  { %v1197_v7 = vmul.f32 0.5, %v1801_v38  ;;  %v1293_v55 = vadd.f32 %v1292_v62, %v1291_v17  ;;  %1497 = vmatpush.msra.mxu3 %v1430_v41  ;;  %v1215_v17 = vld [vmem:[%s3314_s12] sm:$0x1] }
 0x3f6   :  { %1802 = vtanh.f32 %v1166_v4 }
 0x3f7   :  { %v3041_v15 = vadd.f32 0.5, %v1197_v7  ;;  %v1295_v11 = vadd.f32 %v1294_v47, %v1293_v55  ;;  %1498 = vmatpush.msra.mxu3 %v1429_v16 }
 0x3f9   :  { %v1269_v33 = vmul.f32 %v3041_v15, %v3041_v15  ;;  %v1244_v21 = vsel %vm213_vm1, %v3041_v15, 0.0  ;;  %v1297_v23 = vadd.f32 %v1296_v49, %v1295_v11  ;;  %1499 = vmatpush.msra.mxu3 %v1428_v58 }
 0x3fa   :  { %v1245_v24 = vadd.f32 %v1244_v21, %v1243_v13 }
 0x3fb   :  { %v1298_v14 = vsel %vm213_vm1, %v1269_v33, 0.0  ;;  %v1216_v33 = vld [vmem:[%s3315_s13] sm:$0x1] }
 0x3fc   :  { %v1803_v36 = vpop.eup %1802  ;;  %v1299_v57 = vadd.f32 %v1298_v14, %v1297_v23 }
 0x3fd   :  { %v1198_v1 = vmul.f32 0.5, %v1803_v36 }
 0x3ff   :  { %v3057_v18 = vadd.f32 0.5, %v1198_v1  ;;  %v1665_v1 = vld [vmem:[%s3307_s1 + $0x100] sm:$0xff] }
 0x400   :  { %vm1380_vm13 = vcmp.lt.f32.partialorder %v1665_v1, 0.5  ;;  %v1676_v1 = vld [vmem:[%s3307_s1 + $0x158] sm:$0xff] }
 0x401   :  { %v1246_v30 = vsel %vm213_vm1, %v3057_v18, 0.0  ;;  %v1270_v60 = vmul.f32 %v3057_v18, %v3057_v18  ;;  %vm1391_vm11 = vcmp.lt.f32.partialorder %v1676_v1, 0.5 }
 0x402   :  { %v1247_v6 = vadd.f32 %v1246_v30, %v1245_v24 }
 0x403   :  { %v1300_v40 = vsel %vm213_vm1, %v1270_v60, 0.0 }
 0x404   :  { %v1248_v54 = vrot.slane %v1247_v6, 4  ;;  %v1301_v8 = vadd.f32 %v1300_v40, %v1299_v57 }
 0x406   :  { %v1249_v31 = vadd.f32 %v1248_v54, %v1247_v6  ;;  %v1302_v10 = vrot.slane %v1301_v8, 4 }
 0x408   :  { %v1250_v42 = vrot.slane %v1249_v31, 2  ;;  %v1303_v34 = vadd.f32 %v1302_v10, %v1301_v8 }
 0x40a   :  { %v1251_v27 = vadd.f32 %v1250_v42, %v1249_v31  ;;  %v1304_v35 = vrot.slane %v1303_v34, 2 }
 0x40c   :  { %v1252_v37 = vrot.slane %v1251_v27, 1  ;;  %v1305_v38 = vadd.f32 %v1304_v35, %v1303_v34 }
 0x40e   :  { %v1253_v19 = vadd.f32 %v1252_v37, %v1251_v27  ;;  %v1306_v28 = vrot.slane %v1305_v38, 1 }
 0x410   :  { %v1254_v22 = vmul.f32 0.0078125, %v1253_v19  ;;  %v1307_v4 = vadd.f32 %v1306_v28, %v1305_v38 }
 0x412   :  { %v1308_v7 = vmul.f32 0.0078125, %v1307_v4  ;;  %v1309_v56 = vmul.f32 %v1254_v22, %v1254_v22 }
 0x414   :  { %v1310_v45 = vsub.f32 %v1308_v7, %v1309_v56 }
 0x416   :  { %v1311_v59 = vadd.f32 1e-05, %v1310_v45 }
 0x418   :  { %1804 = vrsqrt.f32 %v1311_v59  ;;  %vm1318_vm5 = vweird.f32 %v1311_v59 }
 0x41e   :  { %v1805_v50 = vpop.eup %1804 }
 0x41f   :  { %v1313_v61 = vmul.f32 %v1805_v50, %v1311_v59  ;;  %vm1319_vm15 = vweird.f32 %v1805_v50 }
 0x420   :  { %vm1320_vm9 = vmor %vm1318_vm5, %vm1319_vm15 }
 0x421   :  { %v1314_v62 = vmul.f32 %v1805_v50, %v1313_v61 }
 0x423   :  { %v1315_v9 = vmul.f32 0.5, %v1314_v62 }
 0x425   :  { %v1316_v44 = vsub.f32 1.5, %v1315_v9 }
 0x427   :  { %v1317_v20 = vmul.f32 %v1805_v50, %v1316_v44 }
 0x429   :  { %v1321_v47 = vsel %vm1320_vm9, %v1805_v50, %v1317_v20 }
 0x42a   :  { %v1322_v46 = vmul.f32 %v1321_v47, %v1215_v17  ;;  %v1673_v47 = vld [vmem:[%s3307_s1 + $0x140] sm:$0xff] }
 0x42b   :  { %vm1388_vm0 = vcmp.lt.f32.partialorder %v1673_v47, 0.5 }
 0x42c   :  { %v1323_v36 = vmul.f32 %v1322_v46, %v1254_v22  ;;  %v3082_v55 = vperm.slane %v1322_v46, 0 }
 0x42e   :  { %v1324_v63 = vsub.f32 %v1216_v33, %v1323_v36  ;;  %v1328_v21 = vmul.f32 %v3082_v55, %v2950_v0  ;;  %v1341_v11 = vmul.f32 %v3082_v55, %v3034_v53  ;;  %v1329_v23 = vmul.f32 %v3082_v55, %v2947_v48  ;;  %v1674_v33 = vld [vmem:[%s3307_s1 + $0x148] sm:$0xff] }
 0x42f   :  { %v1336_v24 = vmul.f32 %v3082_v55, %v2998_v29  ;;  %v1337_v0 = vmul.f32 %v3082_v55, %v3000_v43  ;;  %v1338_v57 = vmul.f32 %v3082_v55, %v3012_v2  ;;  %v1339_v53 = vmul.f32 %v3082_v55, %v3019_v3  ;;  %v1666_v29 = vld [vmem:[%s3307_s1 + $0x108] sm:$0xff] }
 0x430   :  { %v3084_v49 = vperm.slane %v1324_v63, 0  ;;  %v1340_v48 = vmul.f32 %v3082_v55, %v3027_v51  ;;  %v1342_v51 = vmul.f32 %v3082_v55, %v3041_v15  ;;  %v1343_v8 = vmul.f32 %v3082_v55, %v3057_v18  ;;  %v1667_v15 = vld [vmem:[%s3307_s1 + $0x110] sm:$0xff] }
 0x431   :  { %vm1381_vm3 = vcmp.lt.f32.partialorder %v1666_v29, 0.5  ;;  %v1330_v34 = vmul.f32 %v3082_v55, %v2953_v12  ;;  %vm1382_vm4 = vcmp.lt.f32.partialorder %v1667_v15, 0.5  ;;  %v1331_v37 = vmul.f32 %v3082_v55, %v2959_v26  ;;  %v1668_v12 = vld [vmem:[%s3307_s1 + $0x118] sm:$0xff]  ;;  %v1669_v26 = vld [vmem:[%s3307_s1 + $0x120] sm:$0xff]  ;;  %v1675_v63 = vld [vmem:[%s3307_s1 + $0x150] sm:$0xff] }
 0x432   :  { %v1347_v13 = vadd.f32 %v3084_v49, %v1328_v21  ;;  %v1348_v60 = vadd.f32 %v3084_v49, %v1329_v23  ;;  %v1355_v43 = vadd.f32 %v3084_v49, %v1336_v24  ;;  %v1356_v6 = vadd.f32 %v3084_v49, %v1337_v0  ;;  %v1678_v0 = vld [vmem:[%s3307_s1 + $0x168] sm:$0xff]  ;;  %v1680_v29 = vld [vmem:[%s3307_s1 + $0x178] sm:$0xff] }
 0x433   :  { %v3114_v40 = vadd.f32 %v3084_v49, %v1338_v57  ;;  %v3117_v2 = vadd.f32 %v3084_v49, %v1339_v53  ;;  %v3120_v3 = vadd.f32 %v3084_v49, %v1340_v48  ;;  %v3123_v54 = vadd.f32 %v3084_v49, %v1341_v11  ;;  %v1679_v57 = vld [vmem:[%s3307_s1 + $0x170] sm:$0xff] }
 0x434   :  { %v1396_v14 = vmul.f32 2.0, %v1347_v13  ;;  %v1397_v31 = vmul.f32 2.0, %v1348_v60  ;;  %v3130_v10 = vadd.f32 %v3084_v49, %v1342_v51  ;;  %v3133_v42 = vadd.f32 %v3084_v49, %v1343_v8 }
 0x435   :  { %v1349_v35 = vadd.f32 %v3084_v49, %v1330_v34  ;;  %v1350_v19 = vadd.f32 %v3084_v49, %v1331_v37  ;;  %vm1383_vm6 = vcmp.lt.f32.partialorder %v1668_v12, 0.5  ;;  %v1332_v22 = vmul.f32 %v3082_v55, %v2966_v5  ;;  %v1670_v5 = vld [vmem:[%s3307_s1 + $0x128] sm:$0xff] }
 0x436   :  { %v1412_v30 = vsel %vm1380_vm13, %v1396_v14, 0.0  ;;  %v1413_v27 = vsel %vm1381_vm3, %v1397_v31, 0.0  ;;  %vm1384_vm8 = vcmp.lt.f32.partialorder %v1669_v26, 0.5  ;;  %v1333_v7 = vmul.f32 %v3082_v55, %v2975_v39  ;;  %v1671_v39 = vld [vmem:[%s3307_s1 + $0x130] sm:$0xff]  ;;  %v1677_v14 = vld [vmem:[%s3307_s1 + $0x160] sm:$0xff] }
 0x437   :  { %1681 = vmatmul.msk.f32.vlgmr.msra.gmra.mxu3 %vm213_vm1, %v1412_v30  ;;  %v1398_v18 = vmul.f32 2.0, %v1349_v35  ;;  %v1399_v28 = vmul.f32 2.0, %v1350_v19  ;;  %v1351_v52 = vadd.f32 %v3084_v49, %v1332_v22  ;;  %vm1385_vm10 = vcmp.lt.f32.partialorder %v1670_v5, 0.5 }
 0x438   :  { %v1352_v16 = vadd.f32 %v3084_v49, %v1333_v7  ;;  %v1334_v58 = vmul.f32 %v3082_v55, %v2978_v32  ;;  %vm1386_vm12 = vcmp.lt.f32.partialorder %v1671_v39, 0.5  ;;  %v1335_v62 = vmul.f32 %v3082_v55, %v2990_v25  ;;  %v1672_v32 = vld [vmem:[%s3307_s1 + $0x138] sm:$0xff] }
 0x439   :  { %v1414_v38 = vsel %vm1382_vm4, %v1398_v18, 0.0  ;;  %v1415_v4 = vsel %vm1383_vm6, %v1399_v28, 0.0  ;;  %v1400_v41 = vmul.f32 2.0, %v1351_v52  ;;  %vm1387_vm14 = vcmp.lt.f32.partialorder %v1672_v32, 0.5 }
 0x43a   :  { %v1401_v45 = vmul.f32 2.0, %v1352_v16  ;;  %v1353_v50 = vadd.f32 %v3084_v49, %v1334_v58  ;;  %v1354_v44 = vadd.f32 %v3084_v49, %v1335_v62  ;;  %v1404_v46 = vmul.f32 2.0, %v1355_v43 }
 0x43b   :  { %v1416_v56 = vsel %vm1384_vm8, %v1400_v41, 0.0  ;;  %v1405_v36 = vmul.f32 2.0, %v1356_v6  ;;  %vm1389_vm2 = vcmp.lt.f32.partialorder %v1674_v33, 0.5  ;;  %v1406_v49 = vmul.f32 2.0, %v3114_v40  ;;  %v3219_v40 = vld [vmem:[%s3316_s15] ss:$0 sm:$0xff] }
 0x43c   :  { %v1417_v59 = vsel %vm1385_vm10, %v1401_v45, 0.0  ;;  %v1402_v61 = vmul.f32 2.0, %v1353_v50  ;;  %v1403_v17 = vmul.f32 2.0, %v1354_v44  ;;  %v1420_v25 = vsel %vm1388_vm0, %v1404_v46, 0.0 }
 0x43d   :  { %v1421_v55 = vsel %vm1389_vm2, %v1405_v36, 0.0  ;;  %vm1390_vm7 = vcmp.lt.f32.partialorder %v1675_v63, 0.5  ;;  %v1407_v11 = vmul.f32 2.0, %v3117_v2  ;;  %v1408_v23 = vmul.f32 2.0, %v3120_v3 }
 0x43e   :  { %v1418_v9 = vsel %vm1386_vm12, %v1402_v61, 0.0  ;;  %v1419_v20 = vsel %vm1387_vm14, %v1403_v17, 0.0  ;;  %v1422_v21 = vsel %vm1390_vm7, %v1406_v49, 0.0  ;;  %vm1392_vm15 = vcmp.lt.f32.partialorder %v1677_v14, 0.5 }
 0x43f   :  { %1682 = vmatmul.msk.f32.gmra.mxu3 %vm213_vm1, %v1413_v27  ;;  %v1423_v13 = vsel %vm1391_vm11, %v1407_v11, 0.0  ;;  %v1424_v24 = vsel %vm1392_vm15, %v1408_v23, 0.0  ;;  %v1409_v30 = vmul.f32 2.0, %v3123_v54  ;;  %vm1393_vm5 = vcmp.lt.f32.partialorder %v1678_v0, 0.5 }
 0x440   :  { %v1410_v53 = vmul.f32 2.0, %v3130_v10  ;;  %vm1394_vm9 = vcmp.lt.f32.partialorder %v1679_v57, 0.5  ;;  %v1411_v43 = vmul.f32 2.0, %v3133_v42  ;;  %vm1395_vm13 = vcmp.lt.f32.partialorder %v1680_v29, 0.5 }
 0x441   :  { %v1425_v60 = vsel %vm1393_vm5, %v1409_v30, 0.0 }
 0x442   :  { %v1426_v48 = vsel %vm1394_vm9, %v1410_v53, 0.0  ;;  %v1427_v6 = vsel %vm1395_vm13, %v1411_v43, 0.0 }
 0x447   :  { %1683 = vmatmul.msk.f32.gmra.mxu3 %vm213_vm1, %v1414_v38 }
 0x44f   :  { %1684 = vmatmul.msk.f32.gmra.mxu3 %vm213_vm1, %v1415_v4 }
 0x457   :  { %1685 = vmatmul.msk.f32.gmra.mxu3 %vm213_vm1, %v1416_v56 }
 0x45f   :  { %1686 = vmatmul.msk.f32.gmra.mxu3 %vm213_vm1, %v1417_v59 }
 0x467   :  { %1687 = vmatmul.msk.f32.gmra.mxu3 %vm213_vm1, %v1418_v9 }
 0x46f   :  { %1688 = vmatmul.msk.f32.gmra.mxu3 %vm213_vm1, %v1419_v20 }
 0x477   :  { %1689 = vmatmul.msk.f32.gmra.mxu3 %vm213_vm1, %v1420_v25 }
 0x47f   :  { %1690 = vmatmul.msk.f32.gmra.mxu3 %vm213_vm1, %v1421_v55 }
 0x487   :  { %1691 = vmatmul.msk.f32.gmra.mxu3 %vm213_vm1, %v1422_v21 }
 0x48f   :  { %1692 = vmatmul.msk.f32.gmra.mxu3 %vm213_vm1, %v1423_v13 }
 0x497   :  { %1693 = vmatmul.msk.f32.gmra.mxu3 %vm213_vm1, %v1424_v24 }
 0x49f   :  { %1694 = vmatmul.msk.f32.gmra.mxu3 %vm213_vm1, %v1425_v60 }
 0x4a7   :  { %1695 = vmatmul.msk.f32.gmra.mxu3 %vm213_vm1, %v1426_v48 }
 0x4af   :  { %1696 = vmatmul.msk.f32.gmra.mxu3 %vm213_vm1, %v1427_v6 }
 0x4ba   :  { %v1501_v2 = vpop.f32.mrf.mxu3 }
 0x4bb   :  { %v1502_v3 = vadd.f32 %v3219_v40, %v1501_v2 }
 0x4bd   :  { %1806 = vtanh.f32 %v1502_v3 }
 0x4c2   :  { %v1504_v54 = vpop.f32.mrf.mxu3 }
 0x4c3   :  { %v1807_v51 = vpop.eup %1806  ;;  %v1505_v8 = vadd.f32 %v3219_v40, %v1504_v54 }
 0x4c4   :  { %1565 = vst.msk [vmem:[%s3317_s16] sm:$0xff] %vm213_vm1, %v1807_v51 }
 0x4c5   :  { %1808 = vtanh.f32 %v1505_v8 }
 0x4ca   :  { %v1507_v31 = vpop.f32.mrf.mxu3 }
 0x4cb   :  { %v1809_v10 = vpop.eup %1808  ;;  %v1508_v42 = vadd.f32 %v3219_v40, %v1507_v31 }
 0x4cc   :  { %1566 = vst.msk [vmem:[%s3317_s16 + $0x8] sm:$0xff] %vm213_vm1, %v1809_v10 }
 0x4cd   :  { %1810 = vtanh.f32 %v1508_v42 }
 0x4d2   :  { %v1510_v34 = vpop.f32.mrf.mxu3 }
 0x4d3   :  { %v1811_v27 = vpop.eup %1810  ;;  %v1511_v35 = vadd.f32 %v3219_v40, %v1510_v34 }
 0x4d4   :  { %1567 = vst.msk [vmem:[%s3317_s16 + $0x10] sm:$0xff] %vm213_vm1, %v1811_v27 }
 0x4d5   :  { %1812 = vtanh.f32 %v1511_v35 }
 0x4da   :  { %v1513_v15 = vpop.f32.mrf.mxu3 }
 0x4db   :  { %v1813_v18 = vpop.eup %1812  ;;  %v1514_v37 = vadd.f32 %v3219_v40, %v1513_v15 }
 0x4dc   :  { %1568 = vst.msk [vmem:[%s3317_s16 + $0x18] sm:$0xff] %vm213_vm1, %v1813_v18 }
 0x4dd   :  { %1814 = vtanh.f32 %v1514_v37 }
 0x4e2   :  { %v1516_v38 = vpop.f32.mrf.mxu3 }
 0x4e3   :  { %v1815_v19 = vpop.eup %1814  ;;  %v1517_v12 = vadd.f32 %v3219_v40, %v1516_v38 }
 0x4e4   :  { %1569 = vst.msk [vmem:[%s3317_s16 + $0x20] sm:$0xff] %vm213_vm1, %v1815_v19 }
 0x4e5   :  { %1816 = vtanh.f32 %v1517_v12 }
 0x4ea   :  { %v1519_v28 = vpop.f32.mrf.mxu3 }
 0x4eb   :  { %v1817_v22 = vpop.eup %1816  ;;  %v1520_v4 = vadd.f32 %v3219_v40, %v1519_v28 }
 0x4ec   :  { %1570 = vst.msk [vmem:[%s3317_s16 + $0x28] sm:$0xff] %vm213_vm1, %v1817_v22 }
 0x4ed   :  { %1818 = vtanh.f32 %v1520_v4 }
 0x4f2   :  { %v1522_v52 = vpop.f32.mrf.mxu3 }
 0x4f3   :  { %v1819_v26 = vpop.eup %1818  ;;  %v1523_v41 = vadd.f32 %v3219_v40, %v1522_v52 }
 0x4f4   :  { %1571 = vst.msk [vmem:[%s3317_s16 + $0x30] sm:$0xff] %vm213_vm1, %v1819_v26 }
 0x4f5   :  { %1820 = vtanh.f32 %v1523_v41 }
 0x4fa   :  { %v1525_v7 = vpop.f32.mrf.mxu3 }
 0x4fb   :  { %v1821_v56 = vpop.eup %1820  ;;  %v1526_v16 = vadd.f32 %v3219_v40, %v1525_v7 }
 0x4fc   :  { %1572 = vst.msk [vmem:[%s3317_s16 + $0x38] sm:$0xff] %vm213_vm1, %v1821_v56 }
 0x4fd   :  { %1822 = vtanh.f32 %v1526_v16 }
 0x502   :  { %v1528_v5 = vpop.f32.mrf.mxu3 }
 0x503   :  { %v1823_v45 = vpop.eup %1822  ;;  %v1529_v58 = vadd.f32 %v3219_v40, %v1528_v5 }
 0x504   :  { %1573 = vst.msk [vmem:[%s3317_s16 + $0x40] sm:$0xff] %vm213_vm1, %v1823_v45 }
 0x505   :  { %1824 = vtanh.f32 %v1529_v58 }
 0x50a   :  { %v1531_v59 = vpop.f32.mrf.mxu3 }
 0x50b   :  { %v1825_v50 = vpop.eup %1824  ;;  %v1532_v39 = vadd.f32 %v3219_v40, %v1531_v59 }
 0x50c   :  { %1574 = vst.msk [vmem:[%s3317_s16 + $0x48] sm:$0xff] %vm213_vm1, %v1825_v50 }
 0x50d   :  { %1826 = vtanh.f32 %v1532_v39 }
 0x512   :  { %v1534_v61 = vpop.f32.mrf.mxu3 }
 0x513   :  { %v1827_v62 = vpop.eup %1826  ;;  %v1535_v9 = vadd.f32 %v3219_v40, %v1534_v61 }
 0x514   :  { %1575 = vst.msk [vmem:[%s3317_s16 + $0x50] sm:$0xff] %vm213_vm1, %v1827_v62 }
 0x515   :  { %1828 = vtanh.f32 %v1535_v9 }
 0x51a   :  { %v1537_v44 = vpop.f32.mrf.mxu3 }
 0x51b   :  { %v1829_v32 = vpop.eup %1828  ;;  %v1538_v17 = vadd.f32 %v3219_v40, %v1537_v44 }
 0x51c   :  { %1576 = vst.msk [vmem:[%s3317_s16 + $0x58] sm:$0xff] %vm213_vm1, %v1829_v32 }
 0x51d   :  { %1830 = vtanh.f32 %v1538_v17 }
 0x522   :  { %v1540_v20 = vpop.f32.mrf.mxu3 }
 0x523   :  { %v1831_v47 = vpop.eup %1830  ;;  %v1541_v46 = vadd.f32 %v3219_v40, %v1540_v20 }
 0x524   :  { %1577 = vst.msk [vmem:[%s3317_s16 + $0x60] sm:$0xff] %vm213_vm1, %v1831_v47 }
 0x525   :  { %1832 = vtanh.f32 %v1541_v46 }
 0x52a   :  { %v1543_v25 = vpop.f32.mrf.mxu3 }
 0x52b   :  { %v1833_v33 = vpop.eup %1832  ;;  %v1544_v36 = vadd.f32 %v3219_v40, %v1543_v25 }
 0x52c   :  { %1578 = vst.msk [vmem:[%s3317_s16 + $0x68] sm:$0xff] %vm213_vm1, %v1833_v33 }
 0x52d   :  { %1834 = vtanh.f32 %v1544_v36 }
 0x532   :  { %v1546_v55 = vpop.f32.mrf.mxu3 }
 0x533   :  { %v1835_v63 = vpop.eup %1834  ;;  %v1547_v49 = vadd.f32 %v3219_v40, %v1546_v55 }
 0x534   :  { %1579 = vst.msk [vmem:[%s3317_s16 + $0x70] sm:$0xff] %vm213_vm1, %v1835_v63 }
 0x535   :  { %1836 = vtanh.f32 %v1547_v49 }
 0x53b   :  { %v1837_v21 = vpop.eup %1836 }
 0x53c   :  { %1580 = vst.msk [vmem:[%s3317_s16 + $0x78] sm:$0xff] %vm213_vm1, %v1837_v21 }

</bundles_post_ra>
